<compile_context>
chip_gen: v5e
topology: v5e:2x2
jax: 0.10.0
libtpu: 0.0.40
codegen_flags: <defaults>
</compile_context>

<pallas_src>
import functools
import math

import jax
import jax.numpy as jnp
from jax import lax
from jax.experimental import pallas as pl
from jax.experimental.pallas import tpu as pltpu


_NORM_EPS = 5e-5      # F.normalize eps
_FAVOR_EPS = 1e-4     # Performer softmax_kernel eps


def _exp_offset(cr, m, k_scale):
    # After F.normalize * sqrt(6), ||e||^2 == 6 exactly (unless eps-clamped),
    # so the Performer diag term is constant:
    #   diag = 0.5 * data_normalizer^2 * ||e||^2 = 0.5 * k_scale^2 / sqrt(Cr)
    # and ratio = 1/sqrt(M) is folded into the exponent as log(ratio).
    diag_c = 0.5 * (k_scale * k_scale) / math.sqrt(cr)
    log_ratio = -0.5 * math.log(m)
    return log_ratio - diag_c


def _l2norm_cf(v, k_scale):
    # channels-first F.normalize(p=2, dim=channel, eps=5e-5) * sqrt(6)
    # (sublane reduce + EUP rsqrt)
    ss = jnp.sum(v * v, axis=0, keepdims=True)
    return v * (k_scale * lax.rsqrt(jnp.maximum(ss, _NORM_EPS * _NORM_EPS)))


# --------------------------- pass 1: global key max --------------------------

def _kmax_kernel(x_ref, w2t_ref, b2_ref, pt_ref, mx_ref, *, k_scale):
    """Running max of projected keys, per batch element, tiled over n.

    x_ref : (1, C, tn) f32   w2t_ref: (Cr, C) bf16   b2_ref: (Cr, 1) f32
    pt_ref: (M, Cr) bf16 (pre-scaled by Cr**-0.25)
    mx_ref: (1, 8, 128) f32  running max (resident across the t axis)
    """
    t = pl.program_id(1)

    @pl.when(t == 0)
    def _():
        mx_ref[...] = jnp.full(mx_ref.shape, -jnp.inf, mx_ref.dtype)

    x_cn = x_ref[0]                                                  # (C, tn)
    e2 = jnp.dot(w2t_ref[...], x_cn.astype(jnp.bfloat16),
                 preferred_element_type=jnp.float32) + b2_ref[...]   # (Cr, tn)
    e2n = _l2norm_cf(e2, k_scale)
    k_dash = jnp.dot(pt_ref[...], e2n.astype(jnp.bfloat16),
                     preferred_element_type=jnp.float32)             # (M, tn)
    mx_ref[...] = jnp.maximum(mx_ref[...], jnp.max(k_dash))


# --------------------------- pass 2: context (keys) ---------------------------

def _kpass_kernel(x_ref, wkt_ref, bk_ref, pt_ref, kshift_ref, ctx_ref, *,
                  cpad, k_scale, feps):
    """Accumulate ctxT = [ (K^T V)^T | k_cumsum | 0 ] over n-tiles.

    x_ref  : (1, C, tn) f32
    wkt_ref: (cpad+Cr, C) bf16  rows = [w_assembly^T | 0 | w_match2^T]
    bk_ref : (cpad+Cr, 1) f32   rows = [b_assembly | 1 | 0 | b_match2]
    pt_ref : (M, Cr) bf16
    kshift_ref: (1,) f32 SMEM   = log(ratio) - diag - global_key_max
    ctx_ref: (1, cpad, M) f32   accumulator (resident across the t axis)
    """
    t = pl.program_id(1)

    @pl.when(t == 0)
    def _():
        ctx_ref[...] = jnp.zeros(ctx_ref.shape, ctx_ref.dtype)

    x_cn = x_ref[0]                                                  # (C, tn)
    fused = jnp.dot(wkt_ref[...], x_cn.astype(jnp.bfloat16),
                    preferred_element_type=jnp.float32) + bk_ref[...]  # (cpad+Cr, tn)
    va_aug = fused[:cpad]            # (cpad, tn): rows [va | ones | zeros]
    e2 = fused[cpad:]                # (Cr, tn)

    e2n = _l2norm_cf(e2, k_scale)
    k_dash = jnp.dot(pt_ref[...], e2n.astype(jnp.bfloat16),
                     preferred_element_type=jnp.float32)             # (M, tn)
    k_feat = jnp.exp(k_dash + kshift_ref[0]) + feps                  # (M, tn)

    # ctxT[c, m] += sum_n va_aug[c, n] * k_feat[m, n]  (transposed-rhs MXU matmul)
    ctx_ref[0] += lax.dot_general(
        va_aug.astype(jnp.bfloat16), k_feat.astype(jnp.bfloat16),
        (((1,), (1,)), ((), ())), preferred_element_type=jnp.float32)


# ------------------------ pass 3: queries + attention ------------------------

def _qpass_kernel(x_ref, wqt_ref, bq_ref, pt_ref, ctx_ref, o_ref, *,
                  c, k_scale, feps, q_off, res_scale):
    """Per n-tile: q features, fused numerator/denominator matmul, residual.

    x_ref : (1, C, tn) f32     wqt_ref: (Cr, C) bf16    bq_ref: (Cr, 1) f32
    pt_ref: (M, Cr) bf16       ctx_ref: (1, cpad, M) f32 (row c = k_cumsum)
    o_ref : (1, C, tn) f32
    """
    x_cn = x_ref[0]                                                  # (C, tn)
    e1 = jnp.dot(wqt_ref[...], x_cn.astype(jnp.bfloat16),
                 preferred_element_type=jnp.float32) + bq_ref[...]   # (Cr, tn)
    e1n = _l2norm_cf(e1, k_scale)
    q_dash = jnp.dot(pt_ref[...], e1n.astype(jnp.bfloat16),
                     preferred_element_type=jnp.float32)             # (M, tn)
    # per-query max over the M feature rows (sublane reduce)
    q_feat = jnp.exp(q_dash - jnp.max(q_dash, axis=0, keepdims=True) + q_off) + feps

    # one MXU pass: rows [:c] numerator^T, row c softmax denominator
    attn = jnp.dot(ctx_ref[0].astype(jnp.bfloat16), q_feat.astype(jnp.bfloat16),
                   preferred_element_type=jnp.float32)               # (cpad, tn)
    num = attn[:c]                                                   # (C, tn)
    d = attn[c:c + 1]                                                # (1, tn)
    scale = pl.reciprocal(d, approx=True) * res_scale                # (1, tn)

    o_ref[0] = (num * scale + x_cn).astype(o_ref.dtype)              # lane-dense store


# ---------------------------------- wrapper ----------------------------------

def _pick_tile(n, target):
    if n <= target or n % 128 != 0:
        return n
    best = 128
    t = 128
    while t <= target:
        if n % t == 0:
            best = t
        t += 128
    return best


def _vmem_limit_bytes(tn, c, cr, m, cpad):
    # rough per-step working set (f32 + bf16 intermediates, double-buffered IO)
    est = tn * (24 * c + 8 * cr + 12 * m + 8 * cpad) + 8 * cpad * m + (1 << 20)
    return int(min(96 * 2**20, max(32 * 2**20, 2 * est)))


def enlca_forward(x_nchw, params, *, res_scale=0.1, tile_n=None):
    N, C, H, W = x_nchw.shape
    n = H * W
    w1, b1, w2, b2, wa, ba, projt = params
    Cr = w1.shape[1]
    M = projt.shape[1]
    k_scale = math.sqrt(6.0)
    dn = float(Cr) ** -0.25
    cpad = ((C + 1 + 127) // 128) * 128          # lane-dense context/attn width

    # NCHW stays NCHW: only flatten spatial (free reshape, no HBM round trip).
    x = x_nchw.reshape(N, C, n)

    if tile_n is None:
        # TODO(synk): raise toward 8192 on v5e/v6e (128 MiB VMEM); keep <=4096 on v7x.
        tile_n = 4096
    tn = _pick_tile(n, tile_n)
    T = n // tn
    vmem_limit = _vmem_limit_bytes(tn, C, Cr, M, cpad)

    # --- pre-transposed / fused weights (channels-first MXU operands) ---
    w2t = jnp.transpose(w2).astype(jnp.bfloat16)                 # (Cr, C)
    b2c = jnp.transpose(b2)                                      # (Cr, 1)
    wqt = jnp.transpose(w1).astype(jnp.bfloat16)                 # (Cr, C)
    bqc = jnp.transpose(b1)                                      # (Cr, 1)
    # k-pass fused conv: rows [w_assembly | 0-pad (bias 1 -> k_cumsum) | w_match2]
    pad_w = jnp.zeros((cpad - C, C), jnp.float32)
    wkt = jnp.concatenate([jnp.transpose(wa), pad_w, jnp.transpose(w2)],
                          axis=0).astype(jnp.bfloat16)           # (cpad+Cr, C)
    pad_b = jnp.concatenate([jnp.ones((1, 1), jnp.float32),
                             jnp.zeros((cpad - C - 1, 1), jnp.float32)], axis=0)
    bkc = jnp.concatenate([jnp.transpose(ba), pad_b, jnp.transpose(b2)],
                          axis=0)                                # (cpad+Cr, 1)
    ptt = (jnp.transpose(projt) * dn).astype(jnp.bfloat16)       # (M, Cr)

    feps = _FAVOR_EPS / math.sqrt(M)
    q_off = _exp_offset(Cr, M, k_scale)

    # ---------------- pass 1: batch-global key max (tiled, bf16) ----------------
    kmax_tiles = pl.pallas_call(
        functools.partial(_kmax_kernel, k_scale=k_scale),
        out_shape=jax.ShapeDtypeStruct((N, 8, 128), jnp.float32),
        grid_spec=pltpu.PrefetchScalarGridSpec(
            num_scalar_prefetch=0,
            grid=(N, T),
            in_specs=[
                pl.BlockSpec((1, C, tn), lambda b, t: (b, 0, t)),
                pl.BlockSpec((Cr, C), lambda b, t: (0, 0)),
                pl.BlockSpec((Cr, 1), lambda b, t: (0, 0)),
                pl.BlockSpec((M, Cr), lambda b, t: (0, 0)),
            ],
            out_specs=pl.BlockSpec((1, 8, 128), lambda b, t: (b, 0, 0)),
        ),
        compiler_params=pltpu.CompilerParams(
            dimension_semantics=("parallel", "arbitrary"),
            vmem_limit_bytes=vmem_limit,
        ),
    )(x, w2t, b2c, ptt)
    k_shift = (q_off - jnp.max(kmax_tiles)).astype(jnp.float32).reshape(1)

    # ---------------- pass 2: context accumulation over n-tiles ----------------
    ctx = pl.pallas_call(
        functools.partial(_kpass_kernel, cpad=cpad, k_scale=k_scale, feps=feps),
        out_shape=jax.ShapeDtypeStruct((N, cpad, M), jnp.float32),
        grid_spec=pltpu.PrefetchScalarGridSpec(
            num_scalar_prefetch=0,
            grid=(N, T),
            in_specs=[
                pl.BlockSpec((1, C, tn), lambda b, t: (b, 0, t)),
                pl.BlockSpec((cpad + Cr, C), lambda b, t: (0, 0)),
                pl.BlockSpec((cpad + Cr, 1), lambda b, t: (0, 0)),
                pl.BlockSpec((M, Cr), lambda b, t: (0, 0)),
                pl.BlockSpec(memory_space=pltpu.MemorySpace.SMEM),
            ],
            out_specs=pl.BlockSpec((1, cpad, M), lambda b, t: (b, 0, 0)),
        ),
        compiler_params=pltpu.CompilerParams(
            dimension_semantics=("parallel", "arbitrary"),
            vmem_limit_bytes=vmem_limit,
        ),
    )(x, wkt, bkc, ptt, k_shift)

    # ---------------- pass 3: queries + attention + residual -------------------
    out = pl.pallas_call(
        functools.partial(_qpass_kernel, c=C, k_scale=k_scale, feps=feps,
                          q_off=q_off, res_scale=res_scale),
        out_shape=jax.ShapeDtypeStruct((N, C, n), x.dtype),
        grid_spec=pltpu.PrefetchScalarGridSpec(
            num_scalar_prefetch=0,
            grid=(N, T),
            in_specs=[
                pl.BlockSpec((1, C, tn), lambda b, t: (b, 0, t)),
                pl.BlockSpec((Cr, C), lambda b, t: (0, 0)),
                pl.BlockSpec((Cr, 1), lambda b, t: (0, 0)),
                pl.BlockSpec((M, Cr), lambda b, t: (0, 0)),
                pl.BlockSpec((1, cpad, M), lambda b, t: (b, 0, 0)),
            ],
            out_specs=pl.BlockSpec((1, C, tn), lambda b, t: (b, 0, t)),
        ),
        compiler_params=pltpu.CompilerParams(
            dimension_semantics=("parallel", "parallel"),
            vmem_limit_bytes=vmem_limit,
        ),
    )(x, wqt, bqc, ptt, ctx)

    return out.reshape(N, C, H, W)


# ------------------------- parameter initialization -------------------------

def gaussian_orthogonal_random_matrix(key, nb_rows, nb_cols):
    """Performer's gaussian_orthogonal_random_matrix with scaling=0."""
    nb_full = nb_rows // nb_cols
    keys = jax.random.split(key, nb_full + 2)
    blocks = []
    for i in range(nb_full):
        g = jax.random.normal(keys[i], (nb_cols, nb_cols), jnp.float32)
        q, _ = jnp.linalg.qr(g)
        blocks.append(q.T)
    rem = nb_rows - nb_full * nb_cols
    if rem > 0:
        g = jax.random.normal(keys[nb_full], (nb_cols, nb_cols), jnp.float32)
        q, _ = jnp.linalg.qr(g)
        blocks.append(q.T[:rem])
    mat = jnp.concatenate(blocks, axis=0)                             # (M, Cr)
    multiplier = jnp.linalg.norm(
        jax.random.normal(keys[nb_full + 1], (nb_rows, nb_cols), jnp.float32),
        axis=1)
    return multiplier[:, None] * mat


def init_params(key, channel, reduction=2, nb_features=128):
    Cr = channel // reduction
    ks = jax.random.split(key, 7)
    w1 = jax.random.normal(ks[0], (channel, Cr), jnp.float32) * 0.05
    b1 = jax.random.normal(ks[1], (1, Cr), jnp.float32) * 0.01
    w2 = jax.random.normal(ks[2], (channel, Cr), jnp.float32) * 0.05
    b2 = jax.random.normal(ks[3], (1, Cr), jnp.float32) * 0.01
    wa = jax.random.normal(ks[4], (channel, channel), jnp.float32) * 0.05
    ba = jax.random.normal(ks[5], (1, channel), jnp.float32) * 0.01
    proj = gaussian_orthogonal_random_matrix(ks[6], nb_features, Cr)  # (M, Cr)
    return w1, b1, w2, b2, wa, ba, proj.T                             # projt: (Cr, M)


# ------------------------------ pure-JAX reference --------------------------

def enlca_reference(x_nchw, params, *, res_scale=0.1):
    """Pure-JAX f32 reference of the ENLCA forward (loose sanity check)."""
    N, C, H, W = x_nchw.shape
    n = H * W
    w1, b1, w2, b2, wa, ba, projt = params
    Cr = w1.shape[1]
    M = projt.shape[1]
    k_scale = math.sqrt(6.0)
    xs = jnp.transpose(x_nchw, (0, 2, 3, 1)).reshape(N, n, C)
    x2d = xs.reshape(N * n, C)
    e1 = x2d @ w1 + b1
    e2 = x2d @ w2 + b2
    va = x2d @ wa + ba

    def l2n(v):
        nrm = jnp.sqrt(jnp.sum(v * v, axis=-1, keepdims=True))
        return v / jnp.maximum(nrm, _NORM_EPS) * k_scale

    e1 = l2n(e1)
    e2 = l2n(e2)
    dn = Cr ** -0.25
    ratio = M ** -0.5
    q_dash = (e1 * dn) @ projt
    k_dash = (e2 * dn) @ projt
    q_diag = 0.5 * dn * dn * jnp.sum(e1 * e1, axis=-1, keepdims=True)
    k_diag = 0.5 * dn * dn * jnp.sum(e2 * e2, axis=-1, keepdims=True)
    qf = ratio * (jnp.exp(q_dash - q_diag
                          - jnp.max(q_dash, axis=-1, keepdims=True)) + _FAVOR_EPS)
    kf = ratio * (jnp.exp(k_dash - k_diag - jnp.max(k_dash)) + _FAVOR_EPS)
    qf = qf.reshape(N, n, M)
    kf = kf.reshape(N, n, M)
    vv = va.reshape(N, n, C)
    k_cumsum = jnp.sum(kf, axis=1)
    d_inv = 1.0 / jnp.sum(qf * k_cumsum[:, None, :], axis=-1)
    context = jnp.einsum('bnm,bnc->bmc', kf, vv)
    attn = jnp.einsum('bnm,bmc->bnc', qf, context) * d_inv[..., None]
    out = attn * res_scale + xs
    return jnp.transpose(out.reshape(N, H, W, C), (0, 3, 1, 2))


if __name__ == "__main__":
    key = jax.random.PRNGKey(0)
    kx, kp = jax.random.split(key)

    # channel=64, reduction=2 -> dim_heads=32, nb_features=128, H=W=16 -> n=256
    N, C, H, W = 2, 64, 16, 16
    x = jax.random.normal(kx, (N, C, H, W), jnp.float32)
    params = init_params(kp, channel=C, reduction=2, nb_features=128)

    # tile_n=128 exercises the multi-tile (T=2) accumulation path on toy shapes.
    fwd = jax.jit(functools.partial(enlca_forward, res_scale=0.1, tile_n=128))
    out = fwd(x, params)
    jax.block_until_ready(out)
    assert out.shape == (N, C, H, W)

    # Loose sanity check vs. f32 reference (kernel uses bf16 MXU operands).
    ref = enlca_reference(x, params, res_scale=0.1)
    assert jnp.allclose(out, ref, rtol=5e-2, atol=5e-2), \
        float(jnp.max(jnp.abs(out - ref)))

    print("KERNEL_OK")
</pallas_src>

<mosaic_0001>
module attributes {stable_mosaic.version = 11 : i64} {
  func.func @_kmax_kernel(%arg0: i32, %arg1: i32, %arg2: memref<1x64x128xf32, #tpu.memory_space<vmem>>, %arg3: memref<32x64xbf16, #tpu.memory_space<vmem>>, %arg4: memref<32x1xf32, #tpu.memory_space<vmem>>, %arg5: memref<128x32xbf16, #tpu.memory_space<vmem>>, %arg6: memref<1x8x128xf32, #tpu.memory_space<vmem>>) attributes {dimension_semantics = [#tpu.dimension_semantics<parallel>, #tpu.dimension_semantics<arbitrary>], iteration_bounds = array<i64: 2, 2>, scalar_prefetch = 0 : i64, scratch_operands = 0 : i64, tpu.core_type = #tpu.core_type<tc>, window_params = [{transform_indices = @transform_0, window_bounds = array<i64: 1, 64, 128>}, {pipeline_mode = #tpu.pipeline_mode<synchronous>, transform_indices = @transform_1, window_bounds = array<i64: 32, 64>}, {pipeline_mode = #tpu.pipeline_mode<synchronous>, transform_indices = @transform_2, window_bounds = array<i64: 32, 1>}, {pipeline_mode = #tpu.pipeline_mode<synchronous>, transform_indices = @transform_3, window_bounds = array<i64: 128, 32>}, {transform_indices = @transform_4, window_bounds = array<i64: 1, 8, 128>}]} {
    %c0_i32 = arith.constant 0 : i32
    %0 = arith.cmpi eq, %arg1, %c0_i32 : i32
    %1 = arith.extui %0 : i1 to i32
    %c0_i32_0 = arith.constant 0 : i32
    %2 = arith.cmpi ne, %1, %c0_i32_0 : i32
    scf.if %2 {
      %cst_20 = arith.constant 0xFF800000 : f32
      %32 = vector.broadcast %cst_20 : f32 to vector<1x8x128xf32>
      %c0_21 = arith.constant 0 : index
      %c0_22 = arith.constant 0 : index
      %c0_23 = arith.constant 0 : index
      %33 = vector.load %arg6[%c0_21, %c0_22, %c0_23] : memref<1x8x128xf32, #tpu.memory_space<vmem>>, vector<1x8x128xf32>
      tpu.vector_store %arg6[%c0_21, %c0_22, %c0_23], %32 {strides = array<i32>} : memref<1x8x128xf32, #tpu.memory_space<vmem>>, vector<1x8x128xf32>,
    } else {
    }
    %c0 = arith.constant 0 : index
    %c0_1 = arith.constant 0 : index
    %c0_2 = arith.constant 0 : index
    %3 = vector.load %arg2[%c0, %c0_1, %c0_2] : memref<1x64x128xf32, #tpu.memory_space<vmem>>, vector<1x64x128xf32>
    %4 = vector.shape_cast %3 : vector<1x64x128xf32> to vector<64x128xf32>
    %c0_3 = arith.constant 0 : index
    %c0_4 = arith.constant 0 : index
    %5 = vector.load %arg3[%c0_3, %c0_4] : memref<32x64xbf16, #tpu.memory_space<vmem>>, vector<32x64xbf16>
    %6 = arith.truncf %4 : vector<64x128xf32> to vector<64x128xbf16>
    %cst = arith.constant dense<0.000000e+00> : vector<32x128xf32>
    %7 = tpu.matmul %5, %6, %cst {dimension_numbers = #tpu.dot_dimension_numbers<[1], [0], [0], [1], [0, 0, 1, 1], [], []>} : vector<32x64xbf16>, vector<64x128xbf16>, vector<32x128xf32> -> vector<32x128xf32>
    %c0_5 = arith.constant 0 : index
    %c0_6 = arith.constant 0 : index
    %8 = vector.load %arg4[%c0_5, %c0_6] : memref<32x1xf32, #tpu.memory_space<vmem>>, vector<32x1xf32>
    %9 = vector.broadcast %8 : vector<32x1xf32> to vector<32x128xf32>
    %10 = arith.addf %7, %9 : vector<32x128xf32>
    %11 = arith.mulf %10, %10 : vector<32x128xf32>
    %cst_7 = arith.constant dense<0.000000e+00> : vector<128xf32>
    %12 = vector.multi_reduction <add>, %11, %cst_7 [0] : vector<32x128xf32> to vector<128xf32>
    %13 = vector.shape_cast %12 : vector<128xf32> to vector<1x128xf32>
    %cst_8 = arith.constant 2.500000e-09 : f32
    %14 = vector.broadcast %cst_8 : f32 to vector<1x128xf32>
    %15 = arith.maximumf %13, %14 : vector<1x128xf32>
    %16 = math.rsqrt %15 : vector<1x128xf32>
    %cst_9 = arith.constant 2.44948983 : f32
    %17 = vector.broadcast %cst_9 : f32 to vector<1x128xf32>
    %18 = arith.mulf %17, %16 : vector<1x128xf32>
    %19 = vector.broadcast %18 : vector<1x128xf32> to vector<32x128xf32>
    %20 = arith.mulf %10, %19 : vector<32x128xf32>
    %c0_10 = arith.constant 0 : index
    %c0_11 = arith.constant 0 : index
    %21 = vector.load %arg5[%c0_10, %c0_11] : memref<128x32xbf16, #tpu.memory_space<vmem>>, vector<128x32xbf16>
    %22 = arith.truncf %20 : vector<32x128xf32> to vector<32x128xbf16>
    %cst_12 = arith.constant dense<0.000000e+00> : vector<128x128xf32>
    %23 = tpu.matmul %21, %22, %cst_12 {dimension_numbers = #tpu.dot_dimension_numbers<[1], [0], [0], [1], [0, 0, 1, 1], [], []>} : vector<128x32xbf16>, vector<32x128xbf16>, vector<128x128xf32> -> vector<128x128xf32>
    %c0_13 = arith.constant 0 : index
    %c0_14 = arith.constant 0 : index
    %c0_15 = arith.constant 0 : index
    %24 = vector.load %arg6[%c0_13, %c0_14, %c0_15] : memref<1x8x128xf32, #tpu.memory_space<vmem>>, vector<1x8x128xf32>
    %25 = vector.shape_cast %23 : vector<128x128xf32> to vector<1x128x128xf32>
    %cst_16 = arith.constant dense<0xFF800000> : vector<1xf32>
    %26 = vector.multi_reduction <maximumf>, %25, %cst_16 [1, 2] : vector<1x128x128xf32> to vector<1xf32>
    %27 = vector.shape_cast %26 : vector<1xf32> to vector<1x1x1xf32>
    %28 = vector.extract %27[0, 0, 0] : f32 from vector<1x1x1xf32>
    %29 = vector.broadcast %28 : f32 to vector<1x8x128xf32>
    %30 = arith.maximumf %24, %29 : vector<1x8x128xf32>
    %c0_17 = arith.constant 0 : index
    %c0_18 = arith.constant 0 : index
    %c0_19 = arith.constant 0 : index
    %31 = vector.load %arg6[%c0_17, %c0_18, %c0_19] : memref<1x8x128xf32, #tpu.memory_space<vmem>>, vector<1x8x128xf32>
    tpu.vector_store %arg6[%c0_17, %c0_18, %c0_19], %30 {strides = array<i32>} : memref<1x8x128xf32, #tpu.memory_space<vmem>>, vector<1x8x128xf32>,
    return
  }
  func.func @transform_0(%arg0: i32, %arg1: i32) -> (i32, i32, i32) {
    %c0_i32 = arith.constant 0 : i32
    %c0_i32_0 = arith.constant 0 : i32
    return %arg0, %c0_i32, %arg1 : i32, i32, i32
  }
  func.func @transform_1(%arg0: i32, %arg1: i32) -> (i32, i32) {
    %c0_i32 = arith.constant 0 : i32
    %c0_i32_0 = arith.constant 0 : i32
    %c0_i32_1 = arith.constant 0 : i32
    return %c0_i32, %c0_i32_0 : i32, i32
  }
  func.func @transform_2(%arg0: i32, %arg1: i32) -> (i32, i32) {
    %c0_i32 = arith.constant 0 : i32
    %c0_i32_0 = arith.constant 0 : i32
    %c0_i32_1 = arith.constant 0 : i32
    return %c0_i32, %c0_i32_0 : i32, i32
  }
  func.func @transform_3(%arg0: i32, %arg1: i32) -> (i32, i32) {
    %c0_i32 = arith.constant 0 : i32
    %c0_i32_0 = arith.constant 0 : i32
    %c0_i32_1 = arith.constant 0 : i32
    return %c0_i32, %c0_i32_0 : i32, i32
  }
  func.func @transform_4(%arg0: i32, %arg1: i32) -> (i32, i32, i32) {
    %c0_i32 = arith.constant 0 : i32
    %c0_i32_0 = arith.constant 0 : i32
    %c0_i32_1 = arith.constant 0 : i32
    return %arg0, %c0_i32, %c0_i32_0 : i32, i32, i32
  }
}

module attributes {stable_mosaic.version = 11 : i64} {
  func.func @_kpass_kernel(%arg0: i32, %arg1: i32, %arg2: memref<1x64x128xf32, #tpu.memory_space<vmem>>, %arg3: memref<160x64xbf16, #tpu.memory_space<vmem>>, %arg4: memref<160x1xf32, #tpu.memory_space<vmem>>, %arg5: memref<128x32xbf16, #tpu.memory_space<vmem>>, %arg6: memref<1xf32, #tpu.memory_space<smem>>, %arg7: memref<1x128x128xf32, #tpu.memory_space<vmem>>) attributes {dimension_semantics = [#tpu.dimension_semantics<parallel>, #tpu.dimension_semantics<arbitrary>], iteration_bounds = array<i64: 2, 2>, scalar_prefetch = 0 : i64, scratch_operands = 0 : i64, tpu.core_type = #tpu.core_type<tc>, window_params = [{transform_indices = @transform_0, window_bounds = array<i64: 1, 64, 128>}, {pipeline_mode = #tpu.pipeline_mode<synchronous>, transform_indices = @transform_1, window_bounds = array<i64: 160, 64>}, {pipeline_mode = #tpu.pipeline_mode<synchronous>, transform_indices = @transform_2, window_bounds = array<i64: 160, 1>}, {pipeline_mode = #tpu.pipeline_mode<synchronous>, transform_indices = @transform_3, window_bounds = array<i64: 128, 32>}, {transform_indices = @transform_4, window_bounds = array<i64: 1>}, {transform_indices = @transform_5, window_bounds = array<i64: 1, 128, 128>}]} {
    %c0_i32 = arith.constant 0 : i32
    %0 = arith.cmpi eq, %arg1, %c0_i32 : i32
    %1 = arith.extui %0 : i1 to i32
    %c0_i32_0 = arith.constant 0 : i32
    %2 = arith.cmpi ne, %1, %c0_i32_0 : i32
    scf.if %2 {
      %cst_22 = arith.constant 0.000000e+00 : f32
      %41 = vector.broadcast %cst_22 : f32 to vector<1x128x128xf32>
      %c0_23 = arith.constant 0 : index
      %c0_24 = arith.constant 0 : index
      %c0_25 = arith.constant 0 : index
      %42 = vector.load %arg7[%c0_23, %c0_24, %c0_25] : memref<1x128x128xf32, #tpu.memory_space<vmem>>, vector<1x128x128xf32>
      tpu.vector_store %arg7[%c0_23, %c0_24, %c0_25], %41 {strides = array<i32>} : memref<1x128x128xf32, #tpu.memory_space<vmem>>, vector<1x128x128xf32>,
    } else {
    }
    %c0 = arith.constant 0 : index
    %c0_1 = arith.constant 0 : index
    %c0_2 = arith.constant 0 : index
    %3 = vector.load %arg2[%c0, %c0_1, %c0_2] : memref<1x64x128xf32, #tpu.memory_space<vmem>>, vector<1x64x128xf32>
    %4 = vector.shape_cast %3 : vector<1x64x128xf32> to vector<64x128xf32>
    %c0_3 = arith.constant 0 : index
    %c0_4 = arith.constant 0 : index
    %5 = vector.load %arg3[%c0_3, %c0_4] : memref<160x64xbf16, #tpu.memory_space<vmem>>, vector<160x64xbf16>
    %6 = arith.truncf %4 : vector<64x128xf32> to vector<64x128xbf16>
    %cst = arith.constant dense<0.000000e+00> : vector<160x128xf32>
    %7 = tpu.matmul %5, %6, %cst {dimension_numbers = #tpu.dot_dimension_numbers<[1], [0], [0], [1], [0, 0, 1, 1], [], []>} : vector<160x64xbf16>, vector<64x128xbf16>, vector<160x128xf32> -> vector<160x128xf32>
    %c0_5 = arith.constant 0 : index
    %c0_6 = arith.constant 0 : index
    %8 = vector.load %arg4[%c0_5, %c0_6] : memref<160x1xf32, #tpu.memory_space<vmem>>, vector<160x1xf32>
    %9 = vector.broadcast %8 : vector<160x1xf32> to vector<160x128xf32>
    %10 = arith.addf %7, %9 : vector<160x128xf32>
    %11 = vector.extract_strided_slice %10 {offsets = [0, 0], sizes = [128, 128], strides = [1, 1]} : vector<160x128xf32> to vector<128x128xf32>
    %12 = vector.extract_strided_slice %10 {offsets = [128, 0], sizes = [32, 128], strides = [1, 1]} : vector<160x128xf32> to vector<32x128xf32>
    %13 = arith.mulf %12, %12 : vector<32x128xf32>
    %cst_7 = arith.constant dense<0.000000e+00> : vector<128xf32>
    %14 = vector.multi_reduction <add>, %13, %cst_7 [0] : vector<32x128xf32> to vector<128xf32>
    %15 = vector.shape_cast %14 : vector<128xf32> to vector<1x128xf32>
    %cst_8 = arith.constant 2.500000e-09 : f32
    %16 = vector.broadcast %cst_8 : f32 to vector<1x128xf32>
    %17 = arith.maximumf %15, %16 : vector<1x128xf32>
    %18 = math.rsqrt %17 : vector<1x128xf32>
    %cst_9 = arith.constant 2.44948983 : f32
    %19 = vector.broadcast %cst_9 : f32 to vector<1x128xf32>
    %20 = arith.mulf %19, %18 : vector<1x128xf32>
    %21 = vector.broadcast %20 : vector<1x128xf32> to vector<32x128xf32>
    %22 = arith.mulf %12, %21 : vector<32x128xf32>
    %c0_10 = arith.constant 0 : index
    %c0_11 = arith.constant 0 : index
    %23 = vector.load %arg5[%c0_10, %c0_11] : memref<128x32xbf16, #tpu.memory_space<vmem>>, vector<128x32xbf16>
    %24 = arith.truncf %22 : vector<32x128xf32> to vector<32x128xbf16>
    %cst_12 = arith.constant dense<0.000000e+00> : vector<128x128xf32>
    %25 = tpu.matmul %23, %24, %cst_12 {dimension_numbers = #tpu.dot_dimension_numbers<[1], [0], [0], [1], [0, 0, 1, 1], [], []>} : vector<128x32xbf16>, vector<32x128xbf16>, vector<128x128xf32> -> vector<128x128xf32>
    %c0_13 = arith.constant 0 : index
    %26 = memref.load %arg6[%c0_13] : memref<1xf32, #tpu.memory_space<smem>>
    %27 = vector.broadcast %26 : f32 to vector<128x128xf32>
    %28 = arith.addf %25, %27 : vector<128x128xf32>
    %29 = math.exp %28 : vector<128x128xf32>
    %cst_14 = arith.constant 8.83883513E-6 : f32
    %30 = vector.broadcast %cst_14 : f32 to vector<128x128xf32>
    %31 = arith.addf %29, %30 : vector<128x128xf32>
    %c0_15 = arith.constant 0 : index
    %c0_16 = arith.constant 0 : index
    %c0_17 = arith.constant 0 : index
    %32 = vector.load %arg7[%c0_15, %c0_16, %c0_17] : memref<1x128x128xf32, #tpu.memory_space<vmem>>, vector<1x128x128xf32>
    %33 = vector.shape_cast %32 : vector<1x128x128xf32> to vector<128x128xf32>
    %34 = arith.truncf %11 : vector<128x128xf32> to vector<128x128xbf16>
    %35 = arith.truncf %31 : vector<128x128xf32> to vector<128x128xbf16>
    %cst_18 = arith.constant dense<0.000000e+00> : vector<128x128xf32>
    %36 = tpu.matmul %34, %35, %cst_18 {dimension_numbers = #tpu.dot_dimension_numbers<[1], [1], [0], [0], [0, 0, 1, 0], [], []>} : vector<128x128xbf16>, vector<128x128xbf16>, vector<128x128xf32> -> vector<128x128xf32>
    %37 = arith.addf %33, %36 : vector<128x128xf32>
    %c0_19 = arith.constant 0 : index
    %c0_20 = arith.constant 0 : index
    %c0_21 = arith.constant 0 : index
    %38 = vector.load %arg7[%c0_19, %c0_20, %c0_21] : memref<1x128x128xf32, #tpu.memory_space<vmem>>, vector<1x128x128xf32>
    %39 = vector.shape_cast %38 : vector<1x128x128xf32> to vector<128x128xf32>
    %40 = vector.shape_cast %37 : vector<128x128xf32> to vector<1x128x128xf32>
    tpu.vector_store %arg7[%c0_19, %c0_20, %c0_21], %40 {strides = array<i32>} : memref<1x128x128xf32, #tpu.memory_space<vmem>>, vector<1x128x128xf32>,
    return
  }
  func.func @transform_0(%arg0: i32, %arg1: i32) -> (i32, i32, i32) {
    %c0_i32 = arith.constant 0 : i32
    %c0_i32_0 = arith.constant 0 : i32
    return %arg0, %c0_i32, %arg1 : i32, i32, i32
  }
  func.func @transform_1(%arg0: i32, %arg1: i32) -> (i32, i32) {
    %c0_i32 = arith.constant 0 : i32
    %c0_i32_0 = arith.constant 0 : i32
    %c0_i32_1 = arith.constant 0 : i32
    return %c0_i32, %c0_i32_0 : i32, i32
  }
  func.func @transform_2(%arg0: i32, %arg1: i32) -> (i32, i32) {
    %c0_i32 = arith.constant 0 : i32
    %c0_i32_0 = arith.constant 0 : i32
    %c0_i32_1 = arith.constant 0 : i32
    return %c0_i32, %c0_i32_0 : i32, i32
  }
  func.func @transform_3(%arg0: i32, %arg1: i32) -> (i32, i32) {
    %c0_i32 = arith.constant 0 : i32
    %c0_i32_0 = arith.constant 0 : i32
    %c0_i32_1 = arith.constant 0 : i32
    return %c0_i32, %c0_i32_0 : i32, i32
  }
  func.func @transform_4(%arg0: i32, %arg1: i32) -> i32 {
    %c0_i32 = arith.constant 0 : i32
    %c0_i32_0 = arith.constant 0 : i32
    return %c0_i32 : i32
  }
  func.func @transform_5(%arg0: i32, %arg1: i32) -> (i32, i32, i32) {
    %c0_i32 = arith.constant 0 : i32
    %c0_i32_0 = arith.constant 0 : i32
    %c0_i32_1 = arith.constant 0 : i32
    return %arg0, %c0_i32, %c0_i32_0 : i32, i32, i32
  }
}

module attributes {stable_mosaic.version = 11 : i64} {
  func.func @_qpass_kernel(%arg0: i32, %arg1: i32, %arg2: memref<1x64x128xf32, #tpu.memory_space<vmem>>, %arg3: memref<32x64xbf16, #tpu.memory_space<vmem>>, %arg4: memref<32x1xf32, #tpu.memory_space<vmem>>, %arg5: memref<128x32xbf16, #tpu.memory_space<vmem>>, %arg6: memref<1x128x128xf32, #tpu.memory_space<vmem>>, %arg7: memref<1x64x128xf32, #tpu.memory_space<vmem>>) attributes {dimension_semantics = [#tpu.dimension_semantics<parallel>, #tpu.dimension_semantics<parallel>], iteration_bounds = array<i64: 2, 2>, scalar_prefetch = 0 : i64, scratch_operands = 0 : i64, tpu.core_type = #tpu.core_type<tc>, window_params = [{transform_indices = @transform_0, window_bounds = array<i64: 1, 64, 128>}, {pipeline_mode = #tpu.pipeline_mode<synchronous>, transform_indices = @transform_1, window_bounds = array<i64: 32, 64>}, {pipeline_mode = #tpu.pipeline_mode<synchronous>, transform_indices = @transform_2, window_bounds = array<i64: 32, 1>}, {pipeline_mode = #tpu.pipeline_mode<synchronous>, transform_indices = @transform_3, window_bounds = array<i64: 128, 32>}, {transform_indices = @transform_4, window_bounds = array<i64: 1, 128, 128>}, {transform_indices = @transform_5, window_bounds = array<i64: 1, 64, 128>}]} {
    %c0 = arith.constant 0 : index
    %c0_0 = arith.constant 0 : index
    %c0_1 = arith.constant 0 : index
    %0 = vector.load %arg2[%c0, %c0_0, %c0_1] : memref<1x64x128xf32, #tpu.memory_space<vmem>>, vector<1x64x128xf32>
    %1 = vector.shape_cast %0 : vector<1x64x128xf32> to vector<64x128xf32>
    %c0_2 = arith.constant 0 : index
    %c0_3 = arith.constant 0 : index
    %2 = vector.load %arg3[%c0_2, %c0_3] : memref<32x64xbf16, #tpu.memory_space<vmem>>, vector<32x64xbf16>
    %3 = arith.truncf %1 : vector<64x128xf32> to vector<64x128xbf16>
    %cst = arith.constant dense<0.000000e+00> : vector<32x128xf32>
    %4 = tpu.matmul %2, %3, %cst {dimension_numbers = #tpu.dot_dimension_numbers<[1], [0], [0], [1], [0, 0, 1, 1], [], []>} : vector<32x64xbf16>, vector<64x128xbf16>, vector<32x128xf32> -> vector<32x128xf32>
    %c0_4 = arith.constant 0 : index
    %c0_5 = arith.constant 0 : index
    %5 = vector.load %arg4[%c0_4, %c0_5] : memref<32x1xf32, #tpu.memory_space<vmem>>, vector<32x1xf32>
    %6 = vector.broadcast %5 : vector<32x1xf32> to vector<32x128xf32>
    %7 = arith.addf %4, %6 : vector<32x128xf32>
    %8 = arith.mulf %7, %7 : vector<32x128xf32>
    %cst_6 = arith.constant dense<0.000000e+00> : vector<128xf32>
    %9 = vector.multi_reduction <add>, %8, %cst_6 [0] : vector<32x128xf32> to vector<128xf32>
    %10 = vector.shape_cast %9 : vector<128xf32> to vector<1x128xf32>
    %cst_7 = arith.constant 2.500000e-09 : f32
    %11 = vector.broadcast %cst_7 : f32 to vector<1x128xf32>
    %12 = arith.maximumf %10, %11 : vector<1x128xf32>
    %13 = math.rsqrt %12 : vector<1x128xf32>
    %cst_8 = arith.constant 2.44948983 : f32
    %14 = vector.broadcast %cst_8 : f32 to vector<1x128xf32>
    %15 = arith.mulf %14, %13 : vector<1x128xf32>
    %16 = vector.broadcast %15 : vector<1x128xf32> to vector<32x128xf32>
    %17 = arith.mulf %7, %16 : vector<32x128xf32>
    %c0_9 = arith.constant 0 : index
    %c0_10 = arith.constant 0 : index
    %18 = vector.load %arg5[%c0_9, %c0_10] : memref<128x32xbf16, #tpu.memory_space<vmem>>, vector<128x32xbf16>
    %19 = arith.truncf %17 : vector<32x128xf32> to vector<32x128xbf16>
    %cst_11 = arith.constant dense<0.000000e+00> : vector<128x128xf32>
    %20 = tpu.matmul %18, %19, %cst_11 {dimension_numbers = #tpu.dot_dimension_numbers<[1], [0], [0], [1], [0, 0, 1, 1], [], []>} : vector<128x32xbf16>, vector<32x128xbf16>, vector<128x128xf32> -> vector<128x128xf32>
    %cst_12 = arith.constant dense<0xFF800000> : vector<128xf32>
    %21 = vector.multi_reduction <maximumf>, %20, %cst_12 [0] : vector<128x128xf32> to vector<128xf32>
    %22 = vector.shape_cast %21 : vector<128xf32> to vector<1x128xf32>
    %23 = vector.broadcast %22 : vector<1x128xf32> to vector<128x128xf32>
    %24 = arith.subf %20, %23 : vector<128x128xf32>
    %cst_13 = arith.constant -2.95634532 : f32
    %25 = vector.broadcast %cst_13 : f32 to vector<128x128xf32>
    %26 = arith.addf %24, %25 : vector<128x128xf32>
    %27 = math.exp %26 : vector<128x128xf32>
    %cst_14 = arith.constant 8.83883513E-6 : f32
    %28 = vector.broadcast %cst_14 : f32 to vector<128x128xf32>
    %29 = arith.addf %27, %28 : vector<128x128xf32>
    %c0_15 = arith.constant 0 : index
    %c0_16 = arith.constant 0 : index
    %c0_17 = arith.constant 0 : index
    %30 = vector.load %arg6[%c0_15, %c0_16, %c0_17] : memref<1x128x128xf32, #tpu.memory_space<vmem>>, vector<1x128x128xf32>
    %31 = vector.shape_cast %30 : vector<1x128x128xf32> to vector<128x128xf32>
    %32 = arith.truncf %31 : vector<128x128xf32> to vector<128x128xbf16>
    %33 = arith.truncf %29 : vector<128x128xf32> to vector<128x128xbf16>
    %cst_18 = arith.constant dense<0.000000e+00> : vector<128x128xf32>
    %34 = tpu.matmul %32, %33, %cst_18 {dimension_numbers = #tpu.dot_dimension_numbers<[1], [0], [0], [1], [0, 0, 1, 1], [], []>} : vector<128x128xbf16>, vector<128x128xbf16>, vector<128x128xf32> -> vector<128x128xf32>
    %35 = vector.extract_strided_slice %34 {offsets = [0, 0], sizes = [64, 128], strides = [1, 1]} : vector<128x128xf32> to vector<64x128xf32>
    %36 = vector.extract_strided_slice %34 {offsets = [64, 0], sizes = [1, 128], strides = [1, 1]} : vector<128x128xf32> to vector<1x128xf32>
    %37 = tpu.reciprocal %36 {approx = true} : vector<1x128xf32> -> vector<1x128xf32>
    %cst_19 = arith.constant 1.000000e-01 : f32
    %38 = vector.broadcast %cst_19 : f32 to vector<1x128xf32>
    %39 = arith.mulf %37, %38 : vector<1x128xf32>
    %40 = vector.broadcast %39 : vector<1x128xf32> to vector<64x128xf32>
    %41 = arith.mulf %35, %40 : vector<64x128xf32>
    %42 = arith.addf %41, %1 : vector<64x128xf32>
    %c0_20 = arith.constant 0 : index
    %c0_21 = arith.constant 0 : index
    %c0_22 = arith.constant 0 : index
    %43 = vector.load %arg7[%c0_20, %c0_21, %c0_22] : memref<1x64x128xf32, #tpu.memory_space<vmem>>, vector<1x64x128xf32>
    %44 = vector.shape_cast %43 : vector<1x64x128xf32> to vector<64x128xf32>
    %45 = vector.shape_cast %42 : vector<64x128xf32> to vector<1x64x128xf32>
    tpu.vector_store %arg7[%c0_20, %c0_21, %c0_22], %45 {strides = array<i32>} : memref<1x64x128xf32, #tpu.memory_space<vmem>>, vector<1x64x128xf32>,
    return
  }
  func.func @transform_0(%arg0: i32, %arg1: i32) -> (i32, i32, i32) {
    %c0_i32 = arith.constant 0 : i32
    %c0_i32_0 = arith.constant 0 : i32
    return %arg0, %c0_i32, %arg1 : i32, i32, i32
  }
  func.func @transform_1(%arg0: i32, %arg1: i32) -> (i32, i32) {
    %c0_i32 = arith.constant 0 : i32
    %c0_i32_0 = arith.constant 0 : i32
    %c0_i32_1 = arith.constant 0 : i32
    return %c0_i32, %c0_i32_0 : i32, i32
  }
  func.func @transform_2(%arg0: i32, %arg1: i32) -> (i32, i32) {
    %c0_i32 = arith.constant 0 : i32
    %c0_i32_0 = arith.constant 0 : i32
    %c0_i32_1 = arith.constant 0 : i32
    return %c0_i32, %c0_i32_0 : i32, i32
  }
  func.func @transform_3(%arg0: i32, %arg1: i32) -> (i32, i32) {
    %c0_i32 = arith.constant 0 : i32
    %c0_i32_0 = arith.constant 0 : i32
    %c0_i32_1 = arith.constant 0 : i32
    return %c0_i32, %c0_i32_0 : i32, i32
  }
  func.func @transform_4(%arg0: i32, %arg1: i32) -> (i32, i32, i32) {
    %c0_i32 = arith.constant 0 : i32
    %c0_i32_0 = arith.constant 0 : i32
    %c0_i32_1 = arith.constant 0 : i32
    return %arg0, %c0_i32, %c0_i32_0 : i32, i32, i32
  }
  func.func @transform_5(%arg0: i32, %arg1: i32) -> (i32, i32, i32) {
    %c0_i32 = arith.constant 0 : i32
    %c0_i32_0 = arith.constant 0 : i32
    return %arg0, %c0_i32, %arg1 : i32, i32, i32
  }
}

</mosaic_0001>

<bundles_post_ra>
// kernel: enlca_forward.5
= control target key start
LH: loop header
LB: loop body
LE: loop exit
PB: predicated region body
PF: predicated region fallthrough
CT: control target
= control target key end

     0   :  { %s1186_s18 = smov 0   ;;  %s1188_s19 = smov 0   ;;  %s1451_s0 = inlined_call_operand.vmem [shape: f32[2,64,256], index: 0, kind: input, shape index: {}]   ;;  %s1452_s1 = inlined_call_operand.vmem [shape: bf16[32,64], index: 1, kind: input, shape index: {}]   ;;  %s1453_s2 = inlined_call_operand.vmem [shape: f32[32,1], index: 2, kind: input, shape index: {}]   ;;  %s1454_s3 = inlined_call_operand.vmem [shape: bf16[128,32], index: 3, kind: input, shape index: {}]   ;;  %s1455_s4 = inlined_call_operand.vmem [shape: f32[2,128,128], index: 4, kind: input, shape index: {}]   ;;  %s1456_s5 = inlined_call_operand.vmem [shape: f32[2,64,256], index: 5, kind: output, shape index: {}]  }
   0x1   :  { %s1190_s20 = smov 0   ;;  %s1192_s21 = smov 0  }
   0x2   :  { %s1194_s22 = smov 0   ;;  %s1196_s23 = smov 0  }
   0x3   :  { %s1198_s24 = smov 0  }
   0x4 LB: > { %s24_s25 = sadd.s32 1, %s1145_s22  ;;  %s27_s26 = sadd.s32 1, %s1149_s23  ;;  %s1153_s24 = sphi %s1198_s24, %s15_s24   ;;  %s1149_s23 = sphi %s1196_s23, %s1463_s23   ;;  %s1145_s22 = sphi %s1194_s22, %s1462_s22   ;;  %s1141_s21 = sphi %s1192_s21, %s1461_s21   ;;  %s1137_s20 = sphi %s1190_s20, %s1460_s20   ;;  %s1133_s19 = sphi %s1188_s19, %s1459_s19   ;;  %s1129_s18 = sphi %s1186_s18, %s1458_s18  }
   0x5   : > { %p25_p0 = scmp.ge.s32.totalorder %s24_s25, 2  ;;  %s916_s27 = sadd.s32 4294967295, %s1153_s24  }
   0x6   : > { %p43_p1 = scmp.ne.s32.totalorder %s1133_s19, %s1129_s18  ;;  %p44_p2 = scmp.eq.s32.totalorder %s1153_s24, 0 }
   0x7   : > { %s1465_s25 = smov (%p25_p0, %s24_s25), 0  ;;  %s1467_s26 = smov (!%p25_p0, %s27_s26), %s1149_s23 }
   0x8   : > { %p29_p3 = scmp.ge.s32.totalorder %s1467_s26, 2  ;;  %p164_p4 = scmp.eq.s32.totalorder %s916_s27, 3 }
   0x9   : > { %s32_s28 = ssub.s32 %s1145_s22, %s1465_s25  ;;  %p45_p5 = por %p44_p2, %p43_p1 }
   0xa   : > { %s1469_s26 = smov (%p29_p3, %s1467_s26), 0  ;;  %p1234_p6 = por %p164_p4, %p43_p1 }
   0xb   : > { %s31_s30 = ssub.s32 %s1149_s23, %s1469_s26  ;;  %s36_s7 = sadd.s32 1, %s1133_s19 }
   0xc   : > { %s33_s6 = sor.u32 %s32_s28, %s31_s30  ;;  %p919_p8 = scmp.ge.s32.totalorder %s1153_s24, 4 }
   0xd   : > { %p34_p7 = scmp.eq.s32.totalorder %s33_s6, 0 }
   0xe   : > { %195 = sbr.rel (%p919_p8) target bundleno = 33 (0x21), region = 28 }
   0xf   : > { %s1242_s8 = scalar_select %p34_p7, %s1133_s19, %s36_s7  }
  0x13   : > { %198 = sbr.rel (!%p45_p5) target bundleno = 33 (0x21), region = 32  ;;  %s200_s9 = sand.u32 (%p45_p5), 1, %s1133_s19  }
  0x14   : > { %s921_s10 = sshll.u32 (%p45_p5), %s1149_s23, 4  ;;  %s920_s11 = sshll.u32 (%p45_p5), %s200_s9, 6 }
  0x15   : > { %s204_s12 = sadd.s32 (%p45_p5), %s1145_s22, %s921_s10  ;;  %s202_s17 = scalar_lea.vmem (%p45_p5), [#allocation2], %s920_s11 }
  0x16   : > { %s922_s13 = sshll.u32 (%p45_p5), %s204_s12, 3 }
  0x17   : > { %s206_s16 = scalar_lea.vmem (%p45_p5), %s1451_s0, %s922_s13 }
  0x18   : > { %v249_v0 = vld [vmem:[%s206_s16] sm:$0xff]  ;;  %v251_v1 = vld [vmem:[%s206_s16 + $0x10] sm:$0xff] }
  0x19   : > { %v253_v2 = vld [vmem:[%s206_s16 + $0x20] sm:$0xff]  ;;  %250 = vst [vmem:[%s202_s17] sm:$0xff] %v249_v0  ;;  %v255_v3 = vld [vmem:[%s206_s16 + $0x30] sm:$0xff] }
  0x1a   : > { %252 = vst [vmem:[%s202_s17 + $0x8] sm:$0xff] %v251_v1  ;;  %v257_v4 = vld [vmem:[%s206_s16 + $0x40] sm:$0xff]  ;;  %v259_v5 = vld [vmem:[%s206_s16 + $0x50] sm:$0xff] }
  0x1b   : > { %254 = vst [vmem:[%s202_s17 + $0x10] sm:$0xff] %v253_v2  ;;  %v261_v6 = vld [vmem:[%s206_s16 + $0x60] sm:$0xff]  ;;  %v263_v7 = vld [vmem:[%s206_s16 + $0x70] sm:$0xff] }
  0x1c   : > { %256 = vst [vmem:[%s202_s17 + $0x18] sm:$0xff] %v255_v3 }
  0x1d   : > { %258 = vst [vmem:[%s202_s17 + $0x20] sm:$0xff] %v257_v4 }
  0x1e   : > { %260 = vst [vmem:[%s202_s17 + $0x28] sm:$0xff] %v259_v5 }
  0x1f   : > { %262 = vst [vmem:[%s202_s17 + $0x30] sm:$0xff] %v261_v6 }
  0x20   : > { %264 = vst [vmem:[%s202_s17 + $0x38] sm:$0xff] %v263_v7 }
  0x21 PF: > { %p923_p9 = scmp.ge.s32.totalorder %s1153_s24, 1  ;;  %p277_p10 = scmp.lt.s32.totalorder %s1153_s24, 5 }
  0x23   : > { %p278_p11 = pnand %p923_p9, %p277_p10 }
  0x24   : > { %s284_s27 = sand.u32 (!%p278_p11), 1, %s1129_s18   ;;  %p315_p12 = scmp.lt.s32.totalorder (!%p278_p11), %s1141_s21, 1 }
  0x25   : > { %281 = sbr.rel (%p278_p11) target bundleno = 743 (0x2e7), region = 74  ;;  %s1257_s6 = sshll.u32 (!%p278_p11), %s284_s27, 6 }
  0x26   : > { %s286_s7 = scalar_lea.vmem (!%p278_p11), [#allocation2], %s1257_s6  ;;  %s1399_s11 = scalar_lea.vmem (!%p278_p11), [#allocation3], %s1257_s6 }
  0x2a   : > { %v337_v8 = vld [vmem:[%s1453_s2] sm:$0xff]  ;;  %v1155_v9 = vmov 0   ;;  %v1260_v10 = vld [vmem:[%s286_s7 + $0x30] sm:$0xff]  ;;  %v1262_v11 = vld [vmem:[%s286_s7 + $0x38] sm:$0xff]  ;;  %vm371_vm0 = vcmask 523264   ;;  %vm484_vm4 = vcmask 261120  }
  0x2b   : > { %1061 = vset.pattern.permute.xlu0 %v1155_v9  ;;  %1062 = vset.pattern.permute.xlu1 %v1155_v9  ;;  %v1264_v12 = vld [vmem:[%s286_s7 + $0x20] sm:$0xff]  ;;  %v336_v13 = vpack.c.bf16 %v1262_v11, %v1260_v10  ;;  %v1268_v14 = vld [vmem:[%s286_s7 + $0x28] sm:$0xff]  ;;  %v339_v15 = vld [vmem:[%s1453_s2 + $0x10] sm:$0xff]  ;;  %s316_s30 = scalar_select %p315_p12, %s1141_s21, 1 }
  0x2c   : > { %343 = vperm.xlu0 %1061, %v337_v8   ;;  %v335_v16 = vpack.c.bf16 %v1268_v14, %v1264_v12  ;;  %353 = vperm.xlu1 %1062, %v339_v15   ;;  %v1275_v17 = vld [vmem:[%s286_s7 + $0x10] sm:$0xff]  ;;  %v1277_v18 = vld [vmem:[%s286_s7 + $0x18] sm:$0xff]  ;;  %v338_v19 = vld [vmem:[%s1453_s2 + $0x8] sm:$0xff]  ;;  %s979_s6 = sshll.u32 (%p1234_p6), %s1141_s21, 4 }
  0x2d   : > { %382 = vmatpush.bf16.msra.mxu0 %v336_v13  ;;  %v334_v20 = vpack.c.bf16 %v1277_v18, %v1275_v17  ;;  %v1284_v21 = vld [vmem:[%s286_s7] sm:$0xff]  ;;  %v1286_v22 = vld [vmem:[%s286_s7 + $0x8] sm:$0xff]  ;;  %v340_v23 = vld [vmem:[%s1453_s2 + $0x18] sm:$0xff]  ;;  %s983_s7 = sshll.u32 %s316_s30, 7  ;;  %s768_s12 = sadd.s32 (%p1234_p6), %s1137_s20, %s979_s6 }
  0x2e   : > { %v333_v24 = vpack.c.bf16 %v1286_v22, %v1284_v21  ;;  %v984_v25 = vld [vmem:[%s1452_s1] sm:$0xff]  ;;  %v985_v26 = vld [vmem:[%s1452_s1 + $0x8] sm:$0xff]  ;;  %v988_v4 = vld [vmem:[%s1454_s3 + $0x10] sm:$0xff]  ;;  %s1378_s10 = scalar_lea.vmem %s1455_s4, %s983_s7  ;;  %s980_s13 = sshll.u32 (%p1234_p6), %s768_s12, 3 }
  0x2f   : > { %v986_v3 = vld [vmem:[%s1454_s3] sm:$0xff]  ;;  %v987_v5 = vld [vmem:[%s1454_s3 + $0x8] sm:$0xff]  ;;  %v989_v6 = vld [vmem:[%s1454_s3 + $0x18] sm:$0xff]  ;;  %s770_s29 = scalar_lea.vmem (%p1234_p6), %s1456_s5, %s980_s13 }
  0x30   : > { %v990_v7 = vld [vmem:[%s1454_s3 + $0x20] sm:$0xff]  ;;  %v991_v8 = vld [vmem:[%s1454_s3 + $0x28] sm:$0xff]  ;;  %v992_v9 = vld [vmem:[%s1454_s3 + $0x30] sm:$0xff] }
  0x31   : > { %383 = vmatpush.bf16.msra.mxu0 %v335_v16  ;;  %v993_v13 = vld [vmem:[%s1454_s3 + $0x38] sm:$0xff] }
  0x34   : > { %348 = vperm.xlu0 %1061, %v338_v19   ;;  %358 = vperm.xlu1 %1062, %v340_v23  }
  0x35   : > { %384 = vmatpush.bf16.msra.mxu0 %v334_v20 }
  0x39   : > { %385 = vmatpush.bf16.msra.mxu0 %v333_v24 }
  0x3c   : > { %936 = vmatmul.msk.bf16.vlgmr.msra.gmra.mxu0 %vm371_vm0, %v984_v25 }
  0x4c   : > { %937 = vmatmul.msk.bf16.gmra.mxu0 %vm371_vm0, %v985_v26 }
  0x9e   : > { %v344_v28 = vpop.permute.xlu0 %343  ;;  %v354_v30 = vpop.permute.xlu1 %353 }
  0xa6   : > { %v349_v31 = vpop.permute.xlu0 %348  ;;  %v359_v39 = vpop.permute.xlu1 %358 }
  0xb9   : > { %v387_v27 = vpop.f32.mrf.mxu0 }
  0xba   : > { %v388_v34 = vadd.f32 %v387_v27, %v344_v28 }
  0xbc   : > { %v397_v37 = vmul.f32 %v388_v34, %v388_v34 }
  0xc1   : > { %v389_v29 = vpop.f32.mrf.mxu0 }
  0xc2   : > { %v390_v33 = vadd.f32 %v389_v29, %v349_v31 }
  0xc4   : > { %v398_v36 = vmul.f32 %v390_v33, %v390_v33 }
  0xc6   : > { %v401_v41 = vadd.f32 %v398_v36, %v397_v37 }
  0xc9   : > { %v392_v32 = vpop.f32.mrf.mxu0 }
  0xca   : > { %v393_v35 = vadd.f32 %v392_v32, %v354_v30 }
  0xcc   : > { %v399_v38 = vmul.f32 %v393_v35, %v393_v35 }
  0xce   : > { %v402_v43 = vadd.f32 %v401_v41, %v399_v38 }
  0xd1   : > { %v394_v40 = vpop.f32.mrf.mxu0 }
  0xd2   : > { %v395_v42 = vadd.f32 %v394_v40, %v359_v39 }
  0xd4   : > { %v400_v44 = vmul.f32 %v395_v42, %v395_v42 }
  0xd6   : > { %v403_v45 = vadd.f32 %v402_v43, %v400_v44 }
  0xd8   : > { %v404_v46 = vrot.slane %v403_v45, 4 }
  0xda   : > { %v405_v47 = vadd.f32 %v404_v46, %v403_v45 }
  0xdc   : > { %v406_v48 = vrot.slane %v405_v47, 2 }
  0xde   : > { %v407_v49 = vadd.f32 %v406_v48, %v405_v47 }
  0xe0   : > { %v408_v50 = vrot.slane %v407_v49, 1 }
  0xe2   : > { %v409_v51 = vadd.f32 %v408_v50, %v407_v49 }
  0xe4   : > { %v410_v52 = vmax.f32 %v409_v51, 2.5e-09 }
  0xe6   : > { %1063 = vrsqrt.f32 %v410_v52  ;;  %vm417_vm2 = vweird.f32 %v410_v52 }
  0xec   : > { %v1064_v53 = vpop.eup %1063 }
  0xed   : > { %v412_v54 = vmul.f32 %v1064_v53, %v410_v52  ;;  %vm418_vm1 = vweird.f32 %v1064_v53 }
  0xee   : > { %vm419_vm3 = vmor %vm417_vm2, %vm418_vm1 }
  0xef   : > { %v413_v55 = vmul.f32 %v1064_v53, %v412_v54 }
  0xf1   : > { %v414_v56 = vmul.f32 0.5, %v413_v55 }
  0xf3   : > { %v415_v57 = vsub.f32 1.5, %v414_v56 }
  0xf5   : > { %v416_v58 = vmul.f32 %v1064_v53, %v415_v57 }
  0xf7   : > { %v420_v59 = vsel %vm419_vm3, %v1064_v53, %v416_v58 }
  0xf8   : > { %v421_v60 = vmul.f32 2.4494898, %v420_v59 }
  0xfa   : > { %v425_v61 = vmul.f32 %v421_v60, %v395_v42  ;;  %v424_v62 = vmul.f32 %v421_v60, %v393_v35  ;;  %v422_v0 = vmul.f32 %v421_v60, %v388_v34  ;;  %v423_v1 = vmul.f32 %v421_v60, %v390_v33 }
  0xfc   : > { %v443_v63 = vpack.c.bf16 %v425_v61, %v424_v62  ;;  %v442_v2 = vpack.c.bf16 %v423_v1, %v422_v0 }
  0xfe   : > { %515 = vmatpush.bf16.msrb.mxu0 %v443_v63  ;;  %994 = vmatpush.bf16.msra.mxu1 %v443_v63 }
 0x102   : > { %516 = vmatpush.bf16.msrb.mxu0 %v442_v2  ;;  %995 = vmatpush.bf16.msra.mxu1 %v442_v2 }
 0x105   : > { %970 = vmatmul.msk.bf16.vlgmr.msrb.gmra.mxu0 %vm484_vm4, %v986_v3  ;;  %972 = vmatmul.msk.bf16.vlgmr.msra.gmra.mxu1 %vm484_vm4, %v988_v4 }
 0x115   : > { %971 = vmatmul.msk.bf16.gmra.mxu0 %vm484_vm4, %v987_v5  ;;  %973 = vmatmul.msk.bf16.gmra.mxu1 %vm484_vm4, %v989_v6 }
 0x125   : > { %974 = vmatmul.msk.bf16.gmra.mxu1 %vm484_vm4, %v990_v7 }
 0x135   : > { %975 = vmatmul.msk.bf16.gmra.mxu1 %vm484_vm4, %v991_v8 }
 0x145   : > { %976 = vmatmul.msk.bf16.gmra.mxu1 %vm484_vm4, %v992_v9 }
 0x155   : > { %977 = vmatmul.msk.bf16.gmra.mxu1 %vm484_vm4, %v993_v13 }
 0x182   : > { %v1323_v15 = vpop.f32.mrf.mxu1  ;;  %v1331_v26 = vpop.f32.mrf.mxu0 }
 0x183   : > { %v558_v35 = vmax.f32 %v1331_v26, %v1323_v15 }
 0x18a   : > { %v1325_v16 = vpop.f32.mrf.mxu1  ;;  %v1333_v28 = vpop.f32.mrf.mxu0 }
 0x18b   : > { %v559_v34 = vmax.f32 %v1333_v28, %v1325_v16 }
 0x192   : > { %v1327_v19 = vpop.f32.mrf.mxu1  ;;  %v1335_v30 = vpop.f32.mrf.mxu0 }
 0x193   : > { %v560_v36 = vmax.f32 %v1335_v30, %v1327_v19 }
 0x19a   : > { %v1329_v20 = vpop.f32.mrf.mxu1  ;;  %v1337_v33 = vpop.f32.mrf.mxu0 }
 0x19b   : > { %v561_v37 = vmax.f32 %v1337_v33, %v1329_v20 }
 0x1a2   : > { %v538_v23 = vpop.f32.mrf.mxu1 }
 0x1a3   : > { %v562_v39 = vmax.f32 %v558_v35, %v538_v23 }
 0x1aa   : > { %v540_v24 = vpop.f32.mrf.mxu1 }
 0x1ab   : > { %v563_v38 = vmax.f32 %v559_v34, %v540_v24 }
 0x1b2   : > { %v543_v25 = vpop.f32.mrf.mxu1 }
 0x1b3   : > { %v564_v40 = vmax.f32 %v560_v36, %v543_v25 }
 0x1ba   : > { %v545_v27 = vpop.f32.mrf.mxu1 }
 0x1bb   : > { %v565_v41 = vmax.f32 %v561_v37, %v545_v27 }
 0x1c2   : > { %v548_v29 = vpop.f32.mrf.mxu1 }
 0x1c3   : > { %v566_v44 = vmax.f32 %v562_v39, %v548_v29 }
 0x1ca   : > { %v550_v31 = vpop.f32.mrf.mxu1 }
 0x1cb   : > { %v567_v42 = vmax.f32 %v563_v38, %v550_v31 }
 0x1cd   : > { %v570_v47 = vmax.f32 %v566_v44, %v567_v42 }
 0x1d2   : > { %v553_v32 = vpop.f32.mrf.mxu1 }
 0x1d3   : > { %v568_v45 = vmax.f32 %v564_v40, %v553_v32 }
 0x1da   : > { %v555_v43 = vpop.f32.mrf.mxu1 }
 0x1db   : > { %v569_v46 = vmax.f32 %v565_v41, %v555_v43 }
 0x1dd   : > { %v571_v48 = vmax.f32 %v568_v45, %v569_v46 }
 0x1df   : > { %v572_v49 = vmax.f32 %v570_v47, %v571_v48 }
 0x1e1   : > { %v573_v50 = vrot.slane %v572_v49, 4 }
 0x1e3   : > { %v574_v51 = vmax.f32 %v572_v49, %v573_v50 }
 0x1e5   : > { %v575_v52 = vrot.slane %v574_v51, 2 }
 0x1e7   : > { %v576_v53 = vmax.f32 %v574_v51, %v575_v52 }
 0x1e9   : > { %v577_v54 = vrot.slane %v576_v53, 1 }
 0x1eb   : > { %v1347_v55 = vmax.f32 %v576_v53, %v577_v54 }
 0x1ed   : > { %v594_v56 = vsub.f32 %v555_v43, %v1347_v55  ;;  %v593_v57 = vsub.f32 %v553_v32, %v1347_v55  ;;  %v591_v58 = vsub.f32 %v548_v29, %v1347_v55  ;;  %v592_v59 = vsub.f32 %v550_v31, %v1347_v55 }
 0x1ee   : > { %v589_v60 = vsub.f32 %v543_v25, %v1347_v55  ;;  %v590_v61 = vsub.f32 %v545_v27, %v1347_v55  ;;  %v587_v1 = vsub.f32 %v538_v23, %v1347_v55  ;;  %v588_v5 = vsub.f32 %v540_v24, %v1347_v55 }
 0x1ef   : > { %v610_v62 = vadd.f32 -2.9563453, %v594_v56  ;;  %v609_v63 = vadd.f32 -2.9563453, %v593_v57  ;;  %v607_v0 = vadd.f32 -2.9563453, %v591_v58  ;;  %v585_v25 = vsub.f32 %v1327_v19, %v1347_v55 }
 0x1f0   : > { %v608_v2 = vadd.f32 -2.9563453, %v592_v59  ;;  %v605_v3 = vadd.f32 -2.9563453, %v589_v60  ;;  %v606_v4 = vadd.f32 -2.9563453, %v590_v61  ;;  %v586_v23 = vsub.f32 %v1329_v20, %v1347_v55 }
 0x1f1   : > { %v641_v6 = vmul.f32 1.442695, %v610_v62  ;;  %v639_v7 = vmul.f32 1.442695, %v609_v63  ;;  %v635_v8 = vmul.f32 1.442695, %v607_v0  ;;  %v583_v24 = vsub.f32 %v1323_v15, %v1347_v55 }
 0x1f2   : > { %v637_v9 = vmul.f32 1.442695, %v608_v2  ;;  %v631_v13 = vmul.f32 1.442695, %v605_v3  ;;  %v603_v29 = vadd.f32 -2.9563453, %v587_v1  ;;  %v584_v19 = vsub.f32 %v1325_v16, %v1347_v55 }
 0x1f3   : > { %1065 = vpow2.f32 %v641_v6  ;;  %v633_v27 = vmul.f32 1.442695, %v606_v4  ;;  %v604_v31 = vadd.f32 -2.9563453, %v588_v5  ;;  %v601_v34 = vadd.f32 -2.9563453, %v585_v25 }
 0x1f4   : > { %1067 = vpow2.f32 %v639_v7  ;;  %v627_v32 = vmul.f32 1.442695, %v603_v29  ;;  %v602_v36 = vadd.f32 -2.9563453, %v586_v23  ;;  %v599_v40 = vadd.f32 -2.9563453, %v583_v24 }
 0x1f5   : > { %1069 = vpow2.f32 %v635_v8  ;;  %v629_v35 = vmul.f32 1.442695, %v604_v31  ;;  %v623_v42 = vmul.f32 1.442695, %v601_v34  ;;  %v581_v15 = vsub.f32 %v1335_v30, %v1347_v55 }
 0x1f6   : > { %1071 = vpow2.f32 %v637_v9  ;;  %v625_v44 = vmul.f32 1.442695, %v602_v36  ;;  %v600_v45 = vadd.f32 -2.9563453, %v584_v19  ;;  %v582_v46 = vsub.f32 %v1337_v33, %v1347_v55 }
 0x1f7   : > { %1073 = vpow2.f32 %v631_v13  ;;  %v619_v51 = vmul.f32 1.442695, %v599_v40  ;;  %v597_v52 = vadd.f32 -2.9563453, %v581_v15  ;;  %v579_v30 = vsub.f32 %v1331_v26, %v1347_v55  ;;  %v667_v40 = vld [vmem:[%s1378_s10 + $0x40] sm:$0xff] }
 0x1f8   : > { %1075 = vpow2.f32 %v633_v27  ;;  %v621_v53 = vmul.f32 1.442695, %v600_v45  ;;  %v598_v54 = vadd.f32 -2.9563453, %v582_v46  ;;  %v580_v56 = vsub.f32 %v1333_v28, %v1347_v55  ;;  %v669_v45 = vld [vmem:[%s1378_s10 + $0x50] sm:$0xff]  ;;  %v670_v46 = vld [vmem:[%s1378_s10 + $0x58] sm:$0xff] }
 0x1f9   : > { %v1066_v37 = vpop.eup %1065  ;;  %1077 = vpow2.f32 %v627_v32  ;;  %v615_v61 = vmul.f32 1.442695, %v597_v52  ;;  %v595_v62 = vadd.f32 -2.9563453, %v579_v30 }
 0x1fa   : > { %v1068_v38 = vpop.eup %1067  ;;  %v658_v39 = vadd.f32 8.838835e-06, %v1066_v37  ;;  %1079 = vpow2.f32 %v629_v35  ;;  %v617_v63 = vmul.f32 1.442695, %v598_v54  ;;  %v596_v26 = vadd.f32 -2.9563453, %v580_v56 }
 0x1fb   : > { %v1070_v41 = vpop.eup %1069  ;;  %v657_v20 = vadd.f32 8.838835e-06, %v1068_v38  ;;  %1081 = vpow2.f32 %v623_v42  ;;  %v611_v28 = vmul.f32 1.442695, %v595_v62  ;;  %v659_v38 = vld [vmem:[%s1378_s10] sm:$0xff]  ;;  %v666_v54 = vld [vmem:[%s1378_s10 + $0x38] sm:$0xff] }
 0x1fc   : > { %v1072_v43 = vpop.eup %1071  ;;  %v655_v48 = vadd.f32 8.838835e-06, %v1070_v41  ;;  %1083 = vpow2.f32 %v625_v44  ;;  %v613_v55 = vmul.f32 1.442695, %v596_v26  ;;  %v668_v41 = vld [vmem:[%s1378_s10 + $0x48] sm:$0xff]  ;;  %v662_v44 = vld [vmem:[%s1378_s10 + $0x18] sm:$0xff] }
 0x1fd   : > { %v1074_v47 = vpop.eup %1073  ;;  %v690_v16 = vpack.c.bf16 %v658_v39, %v657_v20  ;;  %v656_v49 = vadd.f32 8.838835e-06, %v1072_v43  ;;  %1085 = vpow2.f32 %v619_v51  ;;  %v660_v39 = vld [vmem:[%s1378_s10 + $0x8] sm:$0xff]  ;;  %v679_v15 = vpack.c.bf16 %v668_v41, %v667_v40  ;;  %v661_v43 = vld [vmem:[%s1378_s10 + $0x10] sm:$0xff] }
 0x1fe   : > { %v1076_v50 = vpop.eup %1075  ;;  %v653_v58 = vadd.f32 8.838835e-06, %v1074_v47  ;;  %1087 = vpow2.f32 %v621_v53  ;;  %v675_v42 = vpack.c.bf16 %v660_v39, %v659_v38  ;;  %v676_v47 = vpack.c.bf16 %v662_v44, %v661_v43  ;;  %v672_v51 = vld [vmem:[%s1378_s10 + $0x68] sm:$0xff]  ;;  %v665_v53 = vld [vmem:[%s1378_s10 + $0x30] sm:$0xff] }
 0x1ff   : > { %691 = vmatpush.bf16.msra.mxu2 %v690_v16  ;;  %996 = vmatpush.bf16.msra.mxu3 %v690_v16  ;;  %v1078_v33 = vpop.eup %1077  ;;  %v689_v57 = vpack.c.bf16 %v656_v49, %v655_v48  ;;  %v654_v59 = vadd.f32 8.838835e-06, %v1076_v50  ;;  %1089 = vpow2.f32 %v615_v61  ;;  %v680_v16 = vpack.c.bf16 %v670_v46, %v669_v45  ;;  %v663_v48 = vld [vmem:[%s1378_s10 + $0x20] sm:$0xff]  ;;  %v664_v49 = vld [vmem:[%s1378_s10 + $0x28] sm:$0xff]  ;;  %v673_v56 = vld [vmem:[%s1378_s10 + $0x70] sm:$0xff] }
 0x200   : > { %v1080_v60 = vpop.eup %1079  ;;  %v651_v2 = vadd.f32 8.838835e-06, %v1078_v33  ;;  %1091 = vpow2.f32 %v617_v63  ;;  %v671_v50 = vld [vmem:[%s1378_s10 + $0x60] sm:$0xff]  ;;  %v677_v52 = vpack.c.bf16 %v664_v49, %v663_v48  ;;  %v674_v33 = vld [vmem:[%s1378_s10 + $0x78] sm:$0xff] }
 0x201   : > { %v1082_v0 = vpop.eup %1081  ;;  %v688_v1 = vpack.c.bf16 %v654_v59, %v653_v58  ;;  %v652_v3 = vadd.f32 8.838835e-06, %v1080_v60  ;;  %1093 = vpow2.f32 %v611_v28  ;;  %v681_v30 = vpack.c.bf16 %v672_v51, %v671_v50 }
 0x202   : > { %v1084_v4 = vpop.eup %1083  ;;  %v649_v7 = vadd.f32 8.838835e-06, %v1082_v0  ;;  %1095 = vpow2.f32 %v613_v55  ;;  %v682_v58 = vpack.c.bf16 %v674_v33, %v673_v56 }
 0x203   : > { %692 = vmatpush.bf16.msra.mxu2 %v689_v57  ;;  %997 = vmatpush.bf16.msra.mxu3 %v689_v57  ;;  %v1086_v5 = vpop.eup %1085  ;;  %v687_v6 = vpack.c.bf16 %v652_v3, %v651_v2  ;;  %v650_v8 = vadd.f32 8.838835e-06, %v1084_v4  ;;  %v678_v57 = vpack.c.bf16 %v666_v54, %v665_v53 }
 0x204   : > { %v1088_v9 = vpop.eup %1087  ;;  %v647_v25 = vadd.f32 8.838835e-06, %v1086_v5 }
 0x205   : > { %v1090_v13 = vpop.eup %1089  ;;  %v686_v29 = vpack.c.bf16 %v650_v8, %v649_v7  ;;  %v648_v27 = vadd.f32 8.838835e-06, %v1088_v9 }
 0x206   : > { %v1092_v31 = vpop.eup %1091  ;;  %v645_v32 = vadd.f32 8.838835e-06, %v1090_v13 }
 0x207   : > { %693 = vmatpush.bf16.msra.mxu2 %v688_v1  ;;  %998 = vmatpush.bf16.msra.mxu3 %v688_v1  ;;  %v1094_v23 = vpop.eup %1093  ;;  %v685_v24 = vpack.c.bf16 %v648_v27, %v647_v25  ;;  %v646_v34 = vadd.f32 8.838835e-06, %v1092_v31 }
 0x208   : > { %v1096_v35 = vpop.eup %1095  ;;  %v643_v19 = vadd.f32 8.838835e-06, %v1094_v23 }
 0x209   : > { %v684_v36 = vpack.c.bf16 %v646_v34, %v645_v32  ;;  %v644_v37 = vadd.f32 8.838835e-06, %v1096_v35 }
 0x20b   : > { %694 = vmatpush.bf16.msra.mxu2 %v687_v6  ;;  %999 = vmatpush.bf16.msra.mxu3 %v687_v6  ;;  %v683_v20 = vpack.c.bf16 %v644_v37, %v643_v19 }
 0x20f   : > { %695 = vmatpush.bf16.msra.mxu2 %v686_v29  ;;  %1000 = vmatpush.bf16.msra.mxu3 %v686_v29 }
 0x213   : > { %696 = vmatpush.bf16.msra.mxu2 %v685_v24  ;;  %1001 = vmatpush.bf16.msra.mxu3 %v685_v24 }
 0x217   : > { %697 = vmatpush.bf16.msra.mxu2 %v684_v36  ;;  %1002 = vmatpush.bf16.msra.mxu3 %v684_v36 }
 0x21b   : > { %698 = vmatpush.bf16.msra.mxu2 %v683_v20  ;;  %1003 = vmatpush.bf16.msra.mxu3 %v683_v20 }
 0x21e   : > { %699 = vmatmul.bf16.vlgmr.msra.gmra.mxu2 %v675_v42  ;;  %719 = vmatmul.bf16.vlgmr.msra.gmra.mxu3 %v679_v15 }
 0x22e   : > { %704 = vmatmul.bf16.gmra.mxu2 %v676_v47  ;;  %723 = vmatmul.bf16.gmra.mxu3 %v680_v16 }
 0x23e   : > { %709 = vmatmul.bf16.gmra.mxu2 %v677_v52  ;;  %726 = vmatmul.bf16.gmra.mxu3 %v681_v30 }
 0x24e   : > { %714 = vmatmul.bf16.gmra.mxu2 %v678_v57  ;;  %729 = vmatmul.bf16.gmra.mxu3 %v682_v58 }
 0x2a1   : > { %v700_v59 = vpop.f32.mrf.mxu2  ;;  %v720_v60 = vpop.f32.mrf.mxu3 }
 0x2a2   : > { %1097 = vrcp.f32 %v720_v60 }
 0x2a8   : > { %v1098_v61 = vpop.eup %1097 }
 0x2a9   : > { %v734_v62 = vmul.f32 0.1, %v1098_v61  ;;  %v702_v63 = vpop.f32.mrf.mxu2  ;;  %v722_v26 = vpop.f32.mrf.mxu3 }
 0x2ab   : > { %v735_v0 = vperm.slane %v734_v62, 0 }
 0x2ad   : > { %v736_v1 = vmul.f32 %v735_v0, %v700_v59  ;;  %v737_v2 = vmul.f32 %v735_v0, %v702_v63 }
 0x2af   : > { %v744_v3 = vadd.f32 %v736_v1, %v1284_v21  ;;  %v745_v4 = vadd.f32 %v737_v2, %v1286_v22 }
 0x2b1   : > { %752 = vst [vmem:[%s1399_s11] sm:$0xff] %v744_v3  ;;  %v705_v28 = vpop.f32.mrf.mxu2  ;;  %v724_v55 = vpop.f32.mrf.mxu3 }
 0x2b2   : > { %753 = vst [vmem:[%s1399_s11 + $0x8] sm:$0xff] %v745_v4  ;;  %v738_v5 = vmul.f32 %v735_v0, %v705_v28 }
 0x2b4   : > { %v746_v6 = vadd.f32 %v738_v5, %v1275_v17 }
 0x2b6   : > { %754 = vst [vmem:[%s1399_s11 + $0x10] sm:$0xff] %v746_v6 }
 0x2b9   : > { %v707_v7 = vpop.f32.mrf.mxu2  ;;  %v725_v21 = vpop.f32.mrf.mxu3 }
 0x2ba   : > { %v739_v8 = vmul.f32 %v735_v0, %v707_v7 }
 0x2bc   : > { %v747_v22 = vadd.f32 %v739_v8, %v1277_v18 }
 0x2be   : > { %755 = vst [vmem:[%s1399_s11 + $0x18] sm:$0xff] %v747_v22 }
 0x2c1   : > { %v710_v9 = vpop.f32.mrf.mxu2  ;;  %v727_v13 = vpop.f32.mrf.mxu3 }
 0x2c2   : > { %v740_v29 = vmul.f32 %v735_v0, %v710_v9 }
 0x2c4   : > { %v748_v25 = vadd.f32 %v740_v29, %v1264_v12  ;;  %v815_v12 = vld [vmem:[%s1399_s11 + $0x8] sm:$0xff] (%p1234_p6) }
 0x2c5   : > { %816 = vst [vmem:[%s770_s29 + $0x10] sm:$0xff] (%p1234_p6), %v815_v12 }
 0x2c6   : > { %756 = vst [vmem:[%s1399_s11 + $0x20] sm:$0xff] %v748_v25 }
 0x2c9   : > { %v712_v27 = vpop.f32.mrf.mxu2  ;;  %v728_v31 = vpop.f32.mrf.mxu3 }
 0x2ca   : > { %v741_v23 = vmul.f32 %v735_v0, %v712_v27 }
 0x2cc   : > { %v749_v17 = vadd.f32 %v741_v23, %v1268_v14  ;;  %v819_v14 = vld [vmem:[%s1399_s11 + $0x18] sm:$0xff] (%p1234_p6) }
 0x2cd   : > { %v821_v38 = vld [vmem:[%s1399_s11 + $0x20] sm:$0xff] (%p1234_p6)  ;;  %820 = vst [vmem:[%s770_s29 + $0x30] sm:$0xff] (%p1234_p6), %v819_v14 }
 0x2ce   : > { %757 = vst [vmem:[%s1399_s11 + $0x28] sm:$0xff] %v749_v17 }
 0x2cf   : > { %822 = vst [vmem:[%s770_s29 + $0x40] sm:$0xff] (%p1234_p6), %v821_v38 }
 0x2d1   : > { %v715_v24 = vpop.f32.mrf.mxu2  ;;  %v730_v32 = vpop.f32.mrf.mxu3 }
 0x2d2   : > { %v742_v34 = vmul.f32 %v735_v0, %v715_v24 }
 0x2d4   : > { %v750_v18 = vadd.f32 %v742_v34, %v1260_v10  ;;  %v813_v10 = vld [vmem:[%s1399_s11] sm:$0xff] (%p1234_p6) }
 0x2d5   : > { %814 = vst [vmem:[%s770_s29] sm:$0xff] (%p1234_p6), %v813_v10  ;;  %v823_v39 = vld [vmem:[%s1399_s11 + $0x28] sm:$0xff] (%p1234_p6) }
 0x2d6   : > { %758 = vst [vmem:[%s1399_s11 + $0x30] sm:$0xff] %v750_v18 }
 0x2d7   : > { %824 = vst [vmem:[%s770_s29 + $0x50] sm:$0xff] (%p1234_p6), %v823_v39 }
 0x2d9   : > { %v717_v35 = vpop.f32.mrf.mxu2  ;;  %v731_v36 = vpop.f32.mrf.mxu3 }
 0x2da   : > { %v743_v19 = vmul.f32 %v735_v0, %v717_v35  ;;  %766 = sbr.rel (!%p1234_p6) target bundleno = 743 (0x2e7), region = 82 }
 0x2dc   : > { %v751_v37 = vadd.f32 %v743_v19, %v1262_v11  ;;  %v817_v11 = vld [vmem:[%s1399_s11 + $0x10] sm:$0xff] (%p1234_p6) }
 0x2dd   : > { %818 = vst [vmem:[%s770_s29 + $0x20] sm:$0xff] (%p1234_p6), %v817_v11  ;;  %v825_v40 = vld [vmem:[%s1399_s11 + $0x30] sm:$0xff] (%p1234_p6) }
 0x2de   : > { %759 = vst [vmem:[%s1399_s11 + $0x38] sm:$0xff] %v751_v37 }
 0x2df   : > { %826 = vst [vmem:[%s770_s29 + $0x60] sm:$0xff] %v825_v40 }
 0x2e5   : > { %v827_v41 = vld [vmem:[%s1399_s11 + $0x38] sm:$0xff] }
 0x2e6   : > { %828 = vst [vmem:[%s770_s29 + $0x70] sm:$0xff] %v827_v41 }
 0x2e7 PF: > { %s15_s24 = sadd.s32 1, %s1153_s24   ;;  %s1458_s18 = smov %s1133_s19 }
 0x2e8   : > { %p12_p13 = scmp.ge.s32.totalorder %s15_s24, 6   ;;  %s1459_s19 = smov %s1242_s8 }
 0x2e9   : > { %s1460_s20 = smov %s1145_s22  ;;  %s1461_s21 = smov %s1149_s23 }
 0x2ea   : > { %s1462_s22 = smov %s1465_s25  ;;  %s1463_s23 = smov %s1469_s26 }
 0x2eb   :  { %14 = sbr.rel (!%p12_p13) target bundleno = 4 (0x4), region = 154 }

// kernel: enlca_forward.3
= control target key start
LH: loop header
LB: loop body
LE: loop exit
PB: predicated region body
PF: predicated region fallthrough
CT: control target
= control target key end

     0   :  { %s842_s15 = smov 0   ;;  %s844_s16 = smov 0   ;;  %s979_s0 = inlined_call_operand.vmem [shape: f32[2,64,256], index: 0, kind: input, shape index: {}]   ;;  %s980_s1 = inlined_call_operand.vmem [shape: bf16[32,64], index: 1, kind: input, shape index: {}]   ;;  %s981_s2 = inlined_call_operand.vmem [shape: f32[32,1], index: 2, kind: input, shape index: {}]   ;;  %s982_s3 = inlined_call_operand.vmem [shape: bf16[128,32], index: 3, kind: input, shape index: {}]   ;;  %s983_s4 = inlined_call_operand.vmem [shape: f32[2,8,128], index: 4, kind: output, shape index: {}]  }
   0x1   :  { %s846_s17 = smov 0   ;;  %s848_s18 = smov 0  }
   0x2   :  { %s850_s19 = smov 0   ;;  %s852_s20 = smov 0  }
   0x3   :  { %s854_s21 = smov 0  }
   0x4 LB: > { %s23_s22 = sadd.s32 1, %s805_s19  ;;  %s26_s23 = sadd.s32 1, %s809_s20  ;;  %s813_s21 = sphi %s854_s21, %s14_s21   ;;  %s809_s20 = sphi %s852_s20, %s989_s20   ;;  %s805_s19 = sphi %s850_s19, %s988_s19   ;;  %s801_s18 = sphi %s848_s18, %s987_s18   ;;  %s797_s17 = sphi %s846_s17, %s986_s17   ;;  %s793_s16 = sphi %s844_s16, %s985_s16   ;;  %s789_s15 = sphi %s842_s15, %s984_s15  }
   0x5   : > { %p24_p0 = scmp.ge.s32.totalorder %s23_s22, 2  ;;  %p42_p1 = scmp.ne.s32.totalorder %s793_s16, %s789_s15 }
   0x6   : > { %p43_p2 = scmp.eq.s32.totalorder %s813_s21, 0  ;;  %s35_s27 = sadd.s32 1, %s793_s16 }
   0x7   : > { %s991_s22 = smov (%p24_p0, %s23_s22), 0  ;;  %s993_s23 = smov (!%p24_p0, %s26_s23), %s809_s20 }
   0x8   : > { %p44_p3 = por %p43_p2, %p42_p1  ;;  %p28_p4 = scmp.ge.s32.totalorder %s993_s23, 2 }
   0x9   : > { %s31_s24 = ssub.s32 %s805_s19, %s991_s22  ;;  %p621_p6 = scmp.ge.s32.totalorder %s813_s21, 4 }
   0xa   : > { %s995_s23 = smov (%p28_p4, %s993_s23), 0 }
   0xb   : > { %s30_s25 = ssub.s32 %s809_s20, %s995_s23  ;;  %166 = sbr.rel (%p621_p6) target bundleno = 30 (0x1e), region = 28 }
   0xc   : > { %s32_s26 = sor.u32 %s31_s24, %s30_s25 }
   0xd   : > { %p33_p5 = scmp.eq.s32.totalorder %s32_s26, 0 }
   0xf   : > { %s893_s28 = scalar_select %p33_p5, %s793_s16, %s35_s27  }
  0x10   : > { %169 = sbr.rel (!%p44_p3) target bundleno = 30 (0x1e), region = 32  ;;  %s171_s29 = sand.u32 (%p44_p3), 1, %s793_s16  }
  0x11   : > { %s623_s30 = sshll.u32 (%p44_p3), %s809_s20, 4  ;;  %s622_s5 = sshll.u32 (%p44_p3), %s171_s29, 6 }
  0x12   : > { %s175_s6 = sadd.s32 (%p44_p3), %s805_s19, %s623_s30  ;;  %s173_s11 = scalar_lea.vmem (%p44_p3), [#allocation2], %s622_s5 }
  0x13   : > { %s624_s7 = sshll.u32 (%p44_p3), %s175_s6, 3 }
  0x14   : > { %s177_s10 = scalar_lea.vmem (%p44_p3), %s979_s0, %s624_s7 }
  0x15   : > { %v220_v0 = vld [vmem:[%s177_s10] sm:$0xff]  ;;  %v222_v1 = vld [vmem:[%s177_s10 + $0x10] sm:$0xff] }
  0x16   : > { %v224_v2 = vld [vmem:[%s177_s10 + $0x20] sm:$0xff]  ;;  %221 = vst [vmem:[%s173_s11] sm:$0xff] %v220_v0  ;;  %v226_v3 = vld [vmem:[%s177_s10 + $0x30] sm:$0xff] }
  0x17   : > { %223 = vst [vmem:[%s173_s11 + $0x8] sm:$0xff] %v222_v1  ;;  %v228_v4 = vld [vmem:[%s177_s10 + $0x40] sm:$0xff]  ;;  %v230_v5 = vld [vmem:[%s177_s10 + $0x50] sm:$0xff] }
  0x18   : > { %225 = vst [vmem:[%s173_s11 + $0x10] sm:$0xff] %v224_v2  ;;  %v232_v6 = vld [vmem:[%s177_s10 + $0x60] sm:$0xff]  ;;  %v234_v7 = vld [vmem:[%s177_s10 + $0x70] sm:$0xff] }
  0x19   : > { %227 = vst [vmem:[%s173_s11 + $0x18] sm:$0xff] %v226_v3 }
  0x1a   : > { %229 = vst [vmem:[%s173_s11 + $0x20] sm:$0xff] %v228_v4 }
  0x1b   : > { %231 = vst [vmem:[%s173_s11 + $0x28] sm:$0xff] %v230_v5 }
  0x1c   : > { %233 = vst [vmem:[%s173_s11 + $0x30] sm:$0xff] %v232_v6 }
  0x1d   : > { %235 = vst [vmem:[%s173_s11 + $0x38] sm:$0xff] %v234_v7 }
  0x1e PF: > { %p625_p7 = scmp.ge.s32.totalorder %s813_s21, 1  ;;  %p240_p8 = scmp.lt.s32.totalorder %s813_s21, 5 }
  0x20   : > { %p241_p9 = pnand %p625_p7, %p240_p8 }
  0x21   : > { %s247_s12 = sand.u32 (!%p241_p9), 1, %s789_s15   ;;  %p271_p10 = scmp.lt.s32.totalorder (!%p241_p9), %s801_s18, 1 }
  0x22   : > { %244 = sbr.rel (%p241_p9) target bundleno = 627 (0x273), region = 70  ;;  %s626_s13 = sshll.u32 (!%p241_p9), %s247_s12, 6 }
  0x23   : > { %s249_s27 = scalar_lea.vmem (!%p241_p9), [#allocation2], %s626_s13  ;;  %p628_p11 = scmp.ne.s32.totalorder (!%p241_p9), %s797_s17, 0 }
  0x27   : > { %s997_s18 = smov (!%p271_p10, %s801_s18), 1  ;;  %279 = sbr.rel (%p628_p11) target bundleno = 46 (0x2e), region = 78 }
  0x28   : > { %s627_s14 = sshll.u32 %s997_s18, 3 }
  0x29   : > { %s910_s26 = scalar_lea.vmem %s983_s4, %s627_s14 }
  0x2c   : > { %v815_v8 = vmov -inf  }
  0x2d   : > { %280 = vst [vmem:[%s910_s26] sm:$0xff] %v815_v8 }
  0x2e PF: > { %v287_v9 = vld [vmem:[%s249_s27 + $0x30] sm:$0xff]  ;;  %v288_v10 = vld [vmem:[%s249_s27 + $0x38] sm:$0xff]  ;;  %v285_v11 = vld [vmem:[%s249_s27 + $0x20] sm:$0xff]  ;;  %v816_v14 = vmov 0   ;;  %vm331_vm0 = vcmask 523264   ;;  %vm444_vm4 = vcmask 261120  }
  0x2f   : > { %v296_v12 = vpack.c.bf16 %v288_v10, %v287_v9  ;;  %v286_v13 = vld [vmem:[%s249_s27 + $0x28] sm:$0xff]  ;;  %755 = vset.pattern.permute.xlu0 %v816_v14  ;;  %756 = vset.pattern.permute.xlu1 %v816_v14  ;;  %v297_v16 = vld [vmem:[%s981_s2] sm:$0xff]  ;;  %v299_v17 = vld [vmem:[%s981_s2 + $0x10] sm:$0xff] }
  0x30   : > { %v295_v15 = vpack.c.bf16 %v286_v13, %v285_v11  ;;  %v283_v18 = vld [vmem:[%s249_s27 + $0x10] sm:$0xff]  ;;  %v284_v19 = vld [vmem:[%s249_s27 + $0x18] sm:$0xff]  ;;  %303 = vperm.xlu0 %755, %v297_v16   ;;  %313 = vperm.xlu1 %756, %v299_v17   ;;  %v281_v21 = vld [vmem:[%s249_s27] sm:$0xff] }
  0x31   : > { %342 = vmatpush.bf16.msra.mxu0 %v296_v12  ;;  %v294_v20 = vpack.c.bf16 %v284_v19, %v283_v18  ;;  %v282_v22 = vld [vmem:[%s249_s27 + $0x8] sm:$0xff]  ;;  %v300_v24 = vld [vmem:[%s981_s2 + $0x18] sm:$0xff]  ;;  %v681_v26 = vld [vmem:[%s980_s1] sm:$0xff] }
  0x32   : > { %v298_v23 = vld [vmem:[%s981_s2 + $0x8] sm:$0xff]  ;;  %v293_v25 = vpack.c.bf16 %v282_v22, %v281_v21  ;;  %v683_v4 = vld [vmem:[%s982_s3] sm:$0xff]  ;;  %v686_v5 = vld [vmem:[%s982_s3 + $0x18] sm:$0xff] }
  0x33   : > { %v682_v27 = vld [vmem:[%s980_s1 + $0x8] sm:$0xff]  ;;  %v689_v6 = vld [vmem:[%s982_s3 + $0x30] sm:$0xff]  ;;  %v687_v8 = vld [vmem:[%s982_s3 + $0x20] sm:$0xff] }
  0x34   : > { %v684_v7 = vld [vmem:[%s982_s3 + $0x8] sm:$0xff]  ;;  %v690_v9 = vld [vmem:[%s982_s3 + $0x38] sm:$0xff]  ;;  %v685_v10 = vld [vmem:[%s982_s3 + $0x10] sm:$0xff] }
  0x35   : > { %343 = vmatpush.bf16.msra.mxu0 %v295_v15  ;;  %v688_v11 = vld [vmem:[%s982_s3 + $0x28] sm:$0xff] }
  0x38   : > { %308 = vperm.xlu0 %755, %v298_v23   ;;  %318 = vperm.xlu1 %756, %v300_v24  }
  0x39   : > { %344 = vmatpush.bf16.msra.mxu0 %v294_v20 }
  0x3d   : > { %345 = vmatpush.bf16.msra.mxu0 %v293_v25 }
  0x40   : > { %637 = vmatmul.msk.bf16.vlgmr.msra.gmra.mxu0 %vm331_vm0, %v681_v26 }
  0x50   : > { %638 = vmatmul.msk.bf16.gmra.mxu0 %vm331_vm0, %v682_v27 }
  0xa2   : > { %v304_v29 = vpop.permute.xlu0 %303  ;;  %v314_v31 = vpop.permute.xlu1 %313 }
  0xaa   : > { %v309_v32 = vpop.permute.xlu0 %308  ;;  %v319_v40 = vpop.permute.xlu1 %318 }
  0xbd   : > { %v347_v28 = vpop.f32.mrf.mxu0 }
  0xbe   : > { %v348_v35 = vadd.f32 %v347_v28, %v304_v29 }
  0xc0   : > { %v357_v38 = vmul.f32 %v348_v35, %v348_v35 }
  0xc5   : > { %v349_v30 = vpop.f32.mrf.mxu0 }
  0xc6   : > { %v350_v34 = vadd.f32 %v349_v30, %v309_v32 }
  0xc8   : > { %v358_v37 = vmul.f32 %v350_v34, %v350_v34 }
  0xca   : > { %v361_v42 = vadd.f32 %v358_v37, %v357_v38 }
  0xcd   : > { %v352_v33 = vpop.f32.mrf.mxu0 }
  0xce   : > { %v353_v36 = vadd.f32 %v352_v33, %v314_v31 }
  0xd0   : > { %v359_v39 = vmul.f32 %v353_v36, %v353_v36 }
  0xd2   : > { %v362_v44 = vadd.f32 %v361_v42, %v359_v39 }
  0xd5   : > { %v354_v41 = vpop.f32.mrf.mxu0 }
  0xd6   : > { %v355_v43 = vadd.f32 %v354_v41, %v319_v40 }
  0xd8   : > { %v360_v45 = vmul.f32 %v355_v43, %v355_v43 }
  0xda   : > { %v363_v46 = vadd.f32 %v362_v44, %v360_v45 }
  0xdc   : > { %v364_v47 = vrot.slane %v363_v46, 4 }
  0xde   : > { %v365_v48 = vadd.f32 %v364_v47, %v363_v46 }
  0xe0   : > { %v366_v49 = vrot.slane %v365_v48, 2 }
  0xe2   : > { %v367_v50 = vadd.f32 %v366_v49, %v365_v48 }
  0xe4   : > { %v368_v51 = vrot.slane %v367_v50, 1 }
  0xe6   : > { %v369_v52 = vadd.f32 %v368_v51, %v367_v50  ;;  %v518_v50 = vld [vmem:[%s910_s26] sm:$0xff] }
  0xe8   : > { %v370_v53 = vmax.f32 %v369_v52, 2.5e-09 }
  0xea   : > { %757 = vrsqrt.f32 %v370_v53  ;;  %vm377_vm2 = vweird.f32 %v370_v53 }
  0xf0   : > { %v758_v54 = vpop.eup %757 }
  0xf1   : > { %v372_v55 = vmul.f32 %v758_v54, %v370_v53  ;;  %vm378_vm1 = vweird.f32 %v758_v54 }
  0xf2   : > { %vm379_vm3 = vmor %vm377_vm2, %vm378_vm1 }
  0xf3   : > { %v373_v56 = vmul.f32 %v758_v54, %v372_v55 }
  0xf5   : > { %v374_v57 = vmul.f32 0.5, %v373_v56 }
  0xf7   : > { %v375_v58 = vsub.f32 1.5, %v374_v57 }
  0xf9   : > { %v376_v59 = vmul.f32 %v758_v54, %v375_v58 }
  0xfb   : > { %v380_v60 = vsel %vm379_vm3, %v758_v54, %v376_v59 }
  0xfc   : > { %v381_v61 = vmul.f32 2.4494898, %v380_v60 }
  0xfe   : > { %v385_v62 = vmul.f32 %v381_v61, %v355_v43  ;;  %v384_v63 = vmul.f32 %v381_v61, %v353_v36  ;;  %v382_v1 = vmul.f32 %v381_v61, %v348_v35  ;;  %v383_v2 = vmul.f32 %v381_v61, %v350_v34 }
 0x100   : > { %v403_v0 = vpack.c.bf16 %v385_v62, %v384_v63  ;;  %v402_v3 = vpack.c.bf16 %v383_v2, %v382_v1 }
 0x102   : > { %475 = vmatpush.bf16.msra.mxu1 %v403_v0  ;;  %691 = vmatpush.bf16.msra.mxu2 %v403_v0 }
 0x103   : > { %692 = vmatpush.bf16.msra.mxu3 %v403_v0 }
 0x106   : > { %476 = vmatpush.bf16.msra.mxu1 %v402_v3  ;;  %693 = vmatpush.bf16.msra.mxu2 %v402_v3 }
 0x107   : > { %694 = vmatpush.bf16.msra.mxu3 %v402_v3 }
 0x109   : > { %671 = vmatmul.msk.bf16.vlgmr.msra.gmra.mxu1 %vm444_vm4, %v683_v4  ;;  %674 = vmatmul.msk.bf16.vlgmr.msra.gmra.mxu2 %vm444_vm4, %v686_v5 }
 0x10a   : > { %677 = vmatmul.msk.bf16.vlgmr.msra.gmra.mxu3 %vm444_vm4, %v689_v6 }
 0x119   : > { %672 = vmatmul.msk.bf16.gmra.mxu1 %vm444_vm4, %v684_v7  ;;  %675 = vmatmul.msk.bf16.gmra.mxu2 %vm444_vm4, %v687_v8 }
 0x11a   : > { %678 = vmatmul.msk.bf16.gmra.mxu3 %vm444_vm4, %v690_v9 }
 0x129   : > { %673 = vmatmul.msk.bf16.gmra.mxu1 %vm444_vm4, %v685_v10  ;;  %676 = vmatmul.msk.bf16.gmra.mxu2 %vm444_vm4, %v688_v11 }
 0x186   : > { %v478_v12 = vpop.f32.mrf.mxu1 }
 0x18c   : > { %v493_v13 = vpop.f32.mrf.mxu2 }
 0x18d   : > { %v508_v17 = vpop.f32.mrf.mxu3 }
 0x18e   : > { %v480_v14 = vpop.f32.mrf.mxu1 }
 0x194   : > { %v495_v15 = vpop.f32.mrf.mxu2 }
 0x195   : > { %v510_v20 = vpop.f32.mrf.mxu3 }
 0x196   : > { %v483_v16 = vpop.f32.mrf.mxu1 }
 0x197   : > { %v521_v28 = vmax.f32 %v483_v16, %v493_v13 }
 0x19c   : > { %v498_v18 = vpop.f32.mrf.mxu2 }
 0x19d   : > { %v513_v23 = vpop.f32.mrf.mxu3 }
 0x19e   : > { %v485_v19 = vpop.f32.mrf.mxu1 }
 0x19f   : > { %v522_v30 = vmax.f32 %v485_v19, %v495_v15 }
 0x1a4   : > { %v500_v21 = vpop.f32.mrf.mxu2 }
 0x1a5   : > { %v515_v36 = vpop.f32.mrf.mxu3 }
 0x1a6   : > { %v488_v22 = vpop.f32.mrf.mxu1 }
 0x1a7   : > { %v519_v26 = vmax.f32 %v478_v12, %v488_v22 }
 0x1a9   : > { %v523_v31 = vmax.f32 %v519_v26, %v498_v18 }
 0x1ab   : > { %v527_v39 = vmax.f32 %v523_v31, %v508_v17 }
 0x1ac   : > { %v503_v24 = vpop.f32.mrf.mxu2 }
 0x1ad   : > { %v525_v32 = vmax.f32 %v521_v28, %v503_v24 }
 0x1ae   : > { %v490_v25 = vpop.f32.mrf.mxu1 }
 0x1af   : > { %v520_v27 = vmax.f32 %v480_v14, %v490_v25  ;;  %v529_v37 = vmax.f32 %v525_v32, %v513_v23 }
 0x1b1   : > { %v524_v29 = vmax.f32 %v520_v27, %v500_v21 }
 0x1b3   : > { %v528_v35 = vmax.f32 %v524_v29, %v510_v20 }
 0x1b4   : > { %v505_v33 = vpop.f32.mrf.mxu2 }
 0x1b5   : > { %v526_v34 = vmax.f32 %v522_v30, %v505_v33  ;;  %v531_v40 = vmax.f32 %v527_v39, %v528_v35 }
 0x1b7   : > { %v530_v38 = vmax.f32 %v526_v34, %v515_v36 }
 0x1b9   : > { %v532_v41 = vmax.f32 %v529_v37, %v530_v38 }
 0x1bb   : > { %v533_v42 = vmax.f32 %v531_v40, %v532_v41 }
 0x1bd   : > { %534 = vmax.xlane.f32.xlu2 %v533_v42 }
 0x230   : > { %v535_v43 = vpop.xlane.xlu2 %534 }
 0x231   : > { %v536_v44 = vrot.slane %v535_v43, 4 }
 0x233   : > { %v537_v45 = vmax.f32 %v535_v43, %v536_v44 }
 0x235   : > { %v538_v46 = vrot.slane %v537_v45, 2 }
 0x237   : > { %v539_v47 = vmax.f32 %v537_v45, %v538_v46 }
 0x239   : > { %v540_v48 = vrot.slane %v539_v47, 1 }
 0x23b   : > { %v541_v49 = vmax.f32 %v539_v47, %v540_v48 }
 0x23d   : > { %695 = vpush %v541_v49 }
 0x26e   : > { %s696_s10 = spop %695 }
 0x26f   : > { %v543_v51 = vstv %s696_s10 }
 0x270   : > { %v544_v52 = vmax.f32 %v518_v50, %v543_v51 }
 0x272   : > { %545 = vst [vmem:[%s910_s26] sm:$0xff] %v544_v52 }
 0x273 PF: > { %s14_s21 = sadd.s32 1, %s813_s21   ;;  %s984_s15 = smov %s793_s16 }
 0x274   : > { %p11_p12 = scmp.ge.s32.totalorder %s14_s21, 6   ;;  %s985_s16 = smov %s893_s28 }
 0x275   : > { %s986_s17 = smov %s805_s19  ;;  %s987_s18 = smov %s809_s20 }
 0x276   : > { %s988_s19 = smov %s991_s22  ;;  %s989_s20 = smov %s995_s23 }
 0x277   :  { %13 = sbr.rel (!%p11_p12) target bundleno = 4 (0x4), region = 113 }

// kernel: enlca_forward.4
= control target key start
LH: loop header
LB: loop body
LE: loop exit
PB: predicated region body
PF: predicated region fallthrough
CT: control target
= control target key end

     0   :  { %s1718_s0 = inlined_call_operand.vmem [shape: f32[2,64,256], index: 0, kind: input, shape index: {}]   ;;  %s1719_s1 = inlined_call_operand.vmem [shape: bf16[160,64], index: 1, kind: input, shape index: {}]   ;;  %s1720_s2 = inlined_call_operand.vmem [shape: f32[160,1], index: 2, kind: input, shape index: {}]   ;;  %s1721_s3 = inlined_call_operand.vmem [shape: bf16[128,32], index: 3, kind: input, shape index: {}]   ;;  %s1722_s4 = inlined_call_operand.<no memory space> [shape: f32[1], index: 4, kind: input, shape index: {}]   ;;  %s1723_s5 = inlined_call_operand.vmem [shape: f32[2,128,128], index: 5, kind: output, shape index: {}]  }
   0x1   :  { %10 = sst [smem:[#allocation2]] %s1722_s4 }
   0x2   :  { %s1333_s20 = smov 0   ;;  %s1335_s21 = smov 0  }
   0x3   :  { %s1337_s22 = smov 0   ;;  %s1339_s23 = smov 0  }
   0x4   :  { %s1341_s24 = smov 0   ;;  %s1343_s25 = smov 0  }
   0x5   :  { %s1345_s26 = smov 0  }
   0x6 LB: > { %s25_s4 = sadd.s32 1, %s1288_s24  ;;  %s28_s27 = sadd.s32 1, %s1292_s25  ;;  %s1296_s26 = sphi %s1345_s26, %s16_s26   ;;  %s1292_s25 = sphi %s1343_s25, %s1729_s25   ;;  %s1288_s24 = sphi %s1341_s24, %s1728_s24   ;;  %s1284_s23 = sphi %s1339_s23, %s1727_s23   ;;  %s1280_s22 = sphi %s1337_s22, %s1726_s22   ;;  %s1276_s21 = sphi %s1335_s21, %s1725_s21   ;;  %s1272_s20 = sphi %s1333_s20, %s1724_s20  }
   0x7   : > { %p26_p0 = scmp.ge.s32.totalorder %s25_s4, 2  ;;  %p44_p1 = scmp.ne.s32.totalorder %s1276_s21, %s1272_s20 }
   0x8   : > { %p45_p2 = scmp.eq.s32.totalorder %s1296_s26, 0  ;;  %s37_s6 = sadd.s32 1, %s1276_s21 }
   0x9   : > { %s1731_s4 = smov (%p26_p0, %s25_s4), 0  ;;  %s1733_s27 = smov (!%p26_p0, %s28_s27), %s1292_s25 }
   0xa   : > { %p46_p3 = por %p45_p2, %p44_p1  ;;  %p30_p4 = scmp.ge.s32.totalorder %s1733_s27, 2 }
   0xb   : > { %s33_s28 = ssub.s32 %s1288_s24, %s1731_s4  ;;  %p1019_p6 = scmp.ge.s32.totalorder %s1296_s26, 4 }
   0xc   : > { %s1735_s27 = smov (%p30_p4, %s1733_s27), 0 }
   0xd   : > { %s32_s29 = ssub.s32 %s1292_s25, %s1735_s27  ;;  %192 = sbr.rel (%p1019_p6) target bundleno = 32 (0x20), region = 32 }
   0xe   : > { %s34_s30 = sor.u32 %s33_s28, %s32_s29 }
   0xf   : > { %p35_p5 = scmp.eq.s32.totalorder %s34_s30, 0 }
  0x11   : > { %s1384_s7 = scalar_select %p35_p5, %s1276_s21, %s37_s6  }
  0x12   : > { %195 = sbr.rel (!%p46_p3) target bundleno = 32 (0x20), region = 36  ;;  %s197_s8 = sand.u32 (%p46_p3), 1, %s1276_s21  }
  0x13   : > { %s1021_s9 = sshll.u32 (%p46_p3), %s1292_s25, 4  ;;  %s1020_s10 = sshll.u32 (%p46_p3), %s197_s8, 6 }
  0x14   : > { %s201_s11 = sadd.s32 (%p46_p3), %s1288_s24, %s1021_s9  ;;  %s199_s16 = scalar_lea.vmem (%p46_p3), [#allocation3], %s1020_s10 }
  0x15   : > { %s1022_s12 = sshll.u32 (%p46_p3), %s201_s11, 3 }
  0x16   : > { %s203_s15 = scalar_lea.vmem (%p46_p3), %s1718_s0, %s1022_s12 }
  0x17   : > { %v246_v0 = vld [vmem:[%s203_s15] sm:$0xff]  ;;  %v248_v1 = vld [vmem:[%s203_s15 + $0x10] sm:$0xff] }
  0x18   : > { %v250_v2 = vld [vmem:[%s203_s15 + $0x20] sm:$0xff]  ;;  %247 = vst [vmem:[%s199_s16] sm:$0xff] %v246_v0  ;;  %v252_v3 = vld [vmem:[%s203_s15 + $0x30] sm:$0xff] }
  0x19   : > { %249 = vst [vmem:[%s199_s16 + $0x8] sm:$0xff] %v248_v1  ;;  %v254_v4 = vld [vmem:[%s203_s15 + $0x40] sm:$0xff]  ;;  %v256_v5 = vld [vmem:[%s203_s15 + $0x50] sm:$0xff] }
  0x1a   : > { %251 = vst [vmem:[%s199_s16 + $0x10] sm:$0xff] %v250_v2  ;;  %v258_v6 = vld [vmem:[%s203_s15 + $0x60] sm:$0xff]  ;;  %v260_v7 = vld [vmem:[%s203_s15 + $0x70] sm:$0xff] }
  0x1b   : > { %253 = vst [vmem:[%s199_s16 + $0x18] sm:$0xff] %v252_v3 }
  0x1c   : > { %255 = vst [vmem:[%s199_s16 + $0x20] sm:$0xff] %v254_v4 }
  0x1d   : > { %257 = vst [vmem:[%s199_s16 + $0x28] sm:$0xff] %v256_v5 }
  0x1e   : > { %259 = vst [vmem:[%s199_s16 + $0x30] sm:$0xff] %v258_v6 }
  0x1f   : > { %261 = vst [vmem:[%s199_s16 + $0x38] sm:$0xff] %v260_v7 }
  0x20 PF: > { %p1023_p7 = scmp.ge.s32.totalorder %s1296_s26, 1  ;;  %p266_p8 = scmp.lt.s32.totalorder %s1296_s26, 5 }
  0x22   : > { %p267_p9 = pnand %p1023_p7, %p266_p8 }
  0x23   : > { %s273_s17 = sand.u32 (!%p267_p9), 1, %s1272_s20   ;;  %p300_p10 = scmp.lt.s32.totalorder (!%p267_p9), %s1284_s23, 1 }
  0x24   : > { %270 = sbr.rel (%p267_p9) target bundleno = 941 (0x3ad), region = 74  ;;  %s1024_s18 = sshll.u32 (!%p267_p9), %s273_s17, 6 }
  0x25   : > { %s1403_s6 = scalar_lea.vmem (!%p267_p9), [#allocation3], %s1024_s18  ;;  %p1027_p11 = scmp.ne.s32.totalorder (!%p267_p9), %s1280_s22, 0 }
  0x29   : > { %s1737_s23 = smov (!%p300_p10, %s1284_s23), 1  ;;  %309 = sbr.rel (%p1027_p11) target bundleno = 63 (0x3f), region = 82 }
  0x2a   : > { %s1120_s19 = sshll.u32 %s1737_s23, 7 }
  0x2b   : > { %s1401_s30 = scalar_lea.vmem %s1723_s5, %s1120_s19 }
  0x2e   : > { %v1298_v8 = vmov 0.0  }
  0x2f   : > { %310 = vst [vmem:[%s1401_s30] sm:$0xff] %v1298_v8 }
  0x30   : > { %311 = vst [vmem:[%s1401_s30 + $0x8] sm:$0xff] %v1298_v8 }
  0x31   : > { %312 = vst [vmem:[%s1401_s30 + $0x10] sm:$0xff] %v1298_v8 }
  0x32   : > { %313 = vst [vmem:[%s1401_s30 + $0x18] sm:$0xff] %v1298_v8 }
  0x33   : > { %314 = vst [vmem:[%s1401_s30 + $0x20] sm:$0xff] %v1298_v8 }
  0x34   : > { %315 = vst [vmem:[%s1401_s30 + $0x28] sm:$0xff] %v1298_v8 }
  0x35   : > { %316 = vst [vmem:[%s1401_s30 + $0x30] sm:$0xff] %v1298_v8 }
  0x36   : > { %317 = vst [vmem:[%s1401_s30 + $0x38] sm:$0xff] %v1298_v8 }
  0x37   : > { %318 = vst [vmem:[%s1401_s30 + $0x40] sm:$0xff] %v1298_v8 }
  0x38   : > { %319 = vst [vmem:[%s1401_s30 + $0x48] sm:$0xff] %v1298_v8 }
  0x39   : > { %320 = vst [vmem:[%s1401_s30 + $0x50] sm:$0xff] %v1298_v8 }
  0x3a   : > { %321 = vst [vmem:[%s1401_s30 + $0x58] sm:$0xff] %v1298_v8 }
  0x3b   : > { %322 = vst [vmem:[%s1401_s30 + $0x60] sm:$0xff] %v1298_v8 }
  0x3c   : > { %323 = vst [vmem:[%s1401_s30 + $0x68] sm:$0xff] %v1298_v8 }
  0x3d   : > { %324 = vst [vmem:[%s1401_s30 + $0x70] sm:$0xff] %v1298_v8 }
  0x3e   : > { %325 = vst [vmem:[%s1401_s30 + $0x78] sm:$0xff] %v1298_v8 }
  0x3f PF: > { %v332_v9 = vld [vmem:[%s1403_s6 + $0x30] sm:$0xff]  ;;  %v333_v10 = vld [vmem:[%s1403_s6 + $0x38] sm:$0xff]  ;;  %v330_v11 = vld [vmem:[%s1403_s6 + $0x20] sm:$0xff]  ;;  %v1299_v14 = vmov 0   ;;  %vm528_vm0 = vcmask 523264   ;;  %vm707_vm4 = vcmask 261120  }
  0x40   : > { %v357_v12 = vpack.c.bf16 %v333_v10, %v332_v9  ;;  %v331_v13 = vld [vmem:[%s1403_s6 + $0x28] sm:$0xff]  ;;  %1205 = vset.pattern.permute.xlu0 %v1299_v14  ;;  %1206 = vset.pattern.permute.xlu1 %v1299_v14  ;;  %v374_v16 = vld [vmem:[%s1720_s2 + $0x80] sm:$0xff]  ;;  %v376_v17 = vld [vmem:[%s1720_s2 + $0x90] sm:$0xff]  ;;  %s665_s9 = sld [smem:[#allocation2]] }
  0x41   : > { %1207 = vset.pattern.permute.xlu2 %v1299_v14  ;;  %v356_v15 = vpack.c.bf16 %v331_v13, %v330_v11  ;;  %v328_v18 = vld [vmem:[%s1403_s6 + $0x10] sm:$0xff]  ;;  %v329_v19 = vld [vmem:[%s1403_s6 + $0x18] sm:$0xff]  ;;  %460 = vperm.xlu0 %1205, %v374_v16   ;;  %v326_v21 = vld [vmem:[%s1403_s6] sm:$0xff] }
  0x42   : > { %563 = vmatpush.bf16.msra.mxu0 %v357_v12  ;;  %470 = vperm.xlu1 %1206, %v376_v17   ;;  %v355_v20 = vpack.c.bf16 %v329_v19, %v328_v18  ;;  %v327_v22 = vld [vmem:[%s1403_s6 + $0x8] sm:$0xff]  ;;  %v377_v24 = vld [vmem:[%s1720_s2 + $0x98] sm:$0xff]  ;;  %v1121_v26 = vld [vmem:[%s1719_s1] sm:$0xff] }
  0x43   : > { %v375_v23 = vld [vmem:[%s1720_s2 + $0x88] sm:$0xff]  ;;  %v354_v25 = vpack.c.bf16 %v327_v22, %v326_v21  ;;  %v360_v27 = vld [vmem:[%s1720_s2 + $0x10] sm:$0xff]  ;;  %v361_v28 = vld [vmem:[%s1720_s2 + $0x18] sm:$0xff] }
  0x44   : > { %v358_v29 = vld [vmem:[%s1720_s2] sm:$0xff]  ;;  %v359_v30 = vld [vmem:[%s1720_s2 + $0x8] sm:$0xff]  ;;  %v368_v33 = vld [vmem:[%s1720_s2 + $0x50] sm:$0xff] }
  0x45   : > { %380 = vperm.xlu2 %1207, %v358_v29   ;;  %v1122_v31 = vld [vmem:[%s1719_s1 + $0x8] sm:$0xff]  ;;  %v364_v34 = vld [vmem:[%s1720_s2 + $0x30] sm:$0xff]  ;;  %v365_v36 = vld [vmem:[%s1720_s2 + $0x38] sm:$0xff] }
  0x46   : > { %564 = vmatpush.bf16.msra.mxu0 %v356_v15  ;;  %v363_v32 = vld [vmem:[%s1720_s2 + $0x28] sm:$0xff]  ;;  %v1123_v35 = vld [vmem:[%s1719_s1 + $0x10] sm:$0xff]  ;;  %v362_v37 = vld [vmem:[%s1720_s2 + $0x20] sm:$0xff] }
  0x47   : > { %v366_v38 = vld [vmem:[%s1720_s2 + $0x40] sm:$0xff]  ;;  %v1124_v39 = vld [vmem:[%s1719_s1 + $0x18] sm:$0xff]  ;;  %v367_v43 = vld [vmem:[%s1720_s2 + $0x48] sm:$0xff] }
  0x48   : > { %v369_v40 = vld [vmem:[%s1720_s2 + $0x58] sm:$0xff]  ;;  %v1125_v41 = vld [vmem:[%s1719_s1 + $0x20] sm:$0xff]  ;;  %v1126_v44 = vld [vmem:[%s1719_s1 + $0x28] sm:$0xff] }
  0x49   : > { %465 = vperm.xlu0 %1205, %v375_v23   ;;  %v370_v42 = vld [vmem:[%s1720_s2 + $0x60] sm:$0xff]  ;;  %v371_v45 = vld [vmem:[%s1720_s2 + $0x68] sm:$0xff]  ;;  %v372_v46 = vld [vmem:[%s1720_s2 + $0x70] sm:$0xff] }
  0x4a   : > { %565 = vmatpush.bf16.msra.mxu0 %v355_v20  ;;  %475 = vperm.xlu1 %1206, %v377_v24   ;;  %v1127_v47 = vld [vmem:[%s1719_s1 + $0x30] sm:$0xff]  ;;  %v373_v48 = vld [vmem:[%s1720_s2 + $0x78] sm:$0xff]  ;;  %v1129_v51 = vld [vmem:[%s1719_s1 + $0x40] sm:$0xff] }
  0x4b   : > { %v1128_v49 = vld [vmem:[%s1719_s1 + $0x38] sm:$0xff]  ;;  %v1130_v62 = vld [vmem:[%s1719_s1 + $0x48] sm:$0xff] }
  0x4d   : > { %385 = vperm.xlu2 %1207, %v359_v30  }
  0x4e   : > { %566 = vmatpush.bf16.msra.mxu0 %v354_v25 }
  0x51   : > { %1068 = vmatmul.msk.bf16.vlgmr.msra.gmra.mxu0 %vm528_vm0, %v1121_v26  ;;  %390 = vperm.xlu0 %1205, %v360_v27  }
  0x52   : > { %395 = vperm.xlu1 %1206, %v361_v28  }
  0x55   : > { %400 = vperm.xlu2 %1207, %v362_v37  }
  0x59   : > { %405 = vperm.xlu0 %1205, %v363_v32  }
  0x5a   : > { %430 = vperm.xlu1 %1206, %v368_v33  }
  0x5d   : > { %435 = vperm.xlu2 %1207, %v369_v40  }
  0x61   : > { %1069 = vmatmul.msk.bf16.gmra.mxu0 %vm528_vm0, %v1122_v31  ;;  %410 = vperm.xlu0 %1205, %v364_v34  }
  0x62   : > { %415 = vperm.xlu1 %1206, %v365_v36  }
  0x65   : > { %440 = vperm.xlu2 %1207, %v370_v42  }
  0x69   : > { %445 = vperm.xlu0 %1205, %v371_v45  }
  0x6a   : > { %420 = vperm.xlu1 %1206, %v366_v38  }
  0x6d   : > { %425 = vperm.xlu2 %1207, %v367_v43  }
  0x71   : > { %1070 = vmatmul.msk.bf16.gmra.mxu0 %vm528_vm0, %v1123_v35  ;;  %450 = vperm.xlu0 %1205, %v372_v46  }
  0x72   : > { %455 = vperm.xlu1 %1206, %v373_v48  }
  0x81   : > { %1071 = vmatmul.msk.bf16.gmra.mxu0 %vm528_vm0, %v1124_v39 }
  0x91   : > { %1072 = vmatmul.msk.bf16.gmra.mxu0 %vm528_vm0, %v1125_v41 }
  0x9f   : > { %v381_v50 = vpop.permute.xlu2 %380 }
  0xa1   : > { %1073 = vmatmul.msk.bf16.gmra.mxu0 %vm528_vm0, %v1126_v44 }
  0xa7   : > { %v386_v55 = vpop.permute.xlu2 %385 }
  0xaf   : > { %v401_v7 = vpop.permute.xlu2 %400 }
  0xb1   : > { %1074 = vmatmul.msk.bf16.gmra.mxu0 %vm528_vm0, %v1127_v47 }
  0xb3   : > { %v1525_v53 = vpop.permute.xlu0 %460 }
  0xb4   : > { %v1527_v54 = vpop.permute.xlu1 %470 }
  0xb7   : > { %v436_v15 = vpop.permute.xlu2 %435 }
  0xbb   : > { %v466_v60 = vpop.permute.xlu0 %465 }
  0xbc   : > { %v1536_v61 = vpop.permute.xlu1 %475 }
  0xbf   : > { %v441_v22 = vpop.permute.xlu2 %440 }
  0xc1   : > { %1075 = vmatmul.msk.bf16.gmra.mxu0 %vm528_vm0, %v1128_v49 }
  0xc3   : > { %v391_v0 = vpop.permute.xlu0 %390 }
  0xc4   : > { %v396_v1 = vpop.permute.xlu1 %395 }
  0xc7   : > { %v426_v25 = vpop.permute.xlu2 %425 }
  0xcb   : > { %v406_v8 = vpop.permute.xlu0 %405 }
  0xcc   : > { %v431_v13 = vpop.permute.xlu1 %430 }
  0xce   : > { %v568_v52 = vpop.f32.mrf.mxu0 }
  0xcf   : > { %v1530_v57 = vadd.f32 %v568_v52, %v381_v50 }
  0xd1   : > { %1076 = vmatmul.msk.bf16.gmra.mxu0 %vm528_vm0, %v1129_v51 }
  0xd3   : > { %v411_v16 = vpop.permute.xlu0 %410 }
  0xd4   : > { %v416_v17 = vpop.permute.xlu1 %415 }
  0xd6   : > { %v570_v56 = vpop.f32.mrf.mxu0 }
  0xd7   : > { %v1532_v58 = vadd.f32 %v570_v56, %v386_v55 }
  0xd9   : > { %v845_v59 = vpack.c.bf16 %v1532_v58, %v1530_v57  ;;  %v829_v57 = vld [vmem:[%s1401_s30] sm:$0xff]  ;;  %v839_v58 = vld [vmem:[%s1401_s30 + $0x50] sm:$0xff] }
  0xdb   : > { %v446_v36 = vpop.permute.xlu0 %445 }
  0xdc   : > { %v421_v24 = vpop.permute.xlu1 %420 }
  0xde   : > { %v573_v63 = vpop.f32.mrf.mxu0 }
  0xdf   : > { %v1542_v3 = vadd.f32 %v573_v63, %v391_v0 }
  0xe1   : > { %1077 = vmatmul.msk.bf16.gmra.mxu0 %vm528_vm0, %v1130_v62 }
  0xe3   : > { %v451_v42 = vpop.permute.xlu0 %450 }
  0xe4   : > { %v456_v43 = vpop.permute.xlu1 %455 }
  0xe6   : > { %v575_v2 = vpop.f32.mrf.mxu0 }
  0xe7   : > { %v1544_v4 = vadd.f32 %v575_v2, %v396_v1 }
  0xe9   : > { %v846_v5 = vpack.c.bf16 %v1544_v4, %v1542_v3 }
  0xee   : > { %v578_v6 = vpop.f32.mrf.mxu0 }
  0xef   : > { %v1548_v10 = vadd.f32 %v578_v6, %v401_v7 }
  0xf6   : > { %v580_v9 = vpop.f32.mrf.mxu0 }
  0xf7   : > { %v1550_v11 = vadd.f32 %v580_v9, %v406_v8 }
  0xf9   : > { %v847_v12 = vpack.c.bf16 %v1550_v11, %v1548_v10  ;;  %v830_v10 = vld [vmem:[%s1401_s30 + $0x8] sm:$0xff]  ;;  %v840_v11 = vld [vmem:[%s1401_s30 + $0x58] sm:$0xff] }
  0xfe   : > { %v583_v14 = vpop.f32.mrf.mxu0 }
  0xff   : > { %v1554_v19 = vadd.f32 %v583_v14, %v411_v16 }
 0x106   : > { %v585_v18 = vpop.f32.mrf.mxu0 }
 0x107   : > { %v1556_v20 = vadd.f32 %v585_v18, %v416_v17 }
 0x109   : > { %v848_v21 = vpack.c.bf16 %v1556_v20, %v1554_v19 }
 0x10e   : > { %v588_v23 = vpop.f32.mrf.mxu0 }
 0x10f   : > { %v1560_v27 = vadd.f32 %v588_v23, %v421_v24 }
 0x116   : > { %v590_v26 = vpop.f32.mrf.mxu0 }
 0x117   : > { %v1562_v28 = vadd.f32 %v590_v26, %v426_v25 }
 0x119   : > { %v849_v29 = vpack.c.bf16 %v1562_v28, %v1560_v27  ;;  %v831_v27 = vld [vmem:[%s1401_s30 + $0x10] sm:$0xff]  ;;  %v841_v28 = vld [vmem:[%s1401_s30 + $0x60] sm:$0xff] }
 0x11e   : > { %v593_v30 = vpop.f32.mrf.mxu0 }
 0x11f   : > { %v1566_v32 = vadd.f32 %v593_v30, %v431_v13 }
 0x126   : > { %v595_v31 = vpop.f32.mrf.mxu0 }
 0x127   : > { %v1568_v33 = vadd.f32 %v595_v31, %v436_v15 }
 0x129   : > { %v850_v34 = vpack.c.bf16 %v1568_v33, %v1566_v32 }
 0x12e   : > { %v598_v35 = vpop.f32.mrf.mxu0 }
 0x12f   : > { %v1572_v38 = vadd.f32 %v598_v35, %v441_v22 }
 0x136   : > { %v600_v37 = vpop.f32.mrf.mxu0 }
 0x137   : > { %v1574_v39 = vadd.f32 %v600_v37, %v446_v36 }
 0x139   : > { %v851_v40 = vpack.c.bf16 %v1574_v39, %v1572_v38  ;;  %v832_v38 = vld [vmem:[%s1401_s30 + $0x18] sm:$0xff]  ;;  %v842_v39 = vld [vmem:[%s1401_s30 + $0x68] sm:$0xff] }
 0x13e   : > { %v603_v41 = vpop.f32.mrf.mxu0 }
 0x13f   : > { %v1578_v45 = vadd.f32 %v603_v41, %v451_v42  ;;  %v1131_v41 = vld [vmem:[%s1721_s3] sm:$0xff]  ;;  %v1132_v42 = vld [vmem:[%s1721_s3 + $0x8] sm:$0xff] }
 0x146   : > { %v605_v44 = vpop.f32.mrf.mxu0 }
 0x147   : > { %v1580_v46 = vadd.f32 %v605_v44, %v456_v43  ;;  %v1133_v43 = vld [vmem:[%s1721_s3 + $0x10] sm:$0xff]  ;;  %v1134_v44 = vld [vmem:[%s1721_s3 + $0x18] sm:$0xff] }
 0x149   : > { %v852_v47 = vpack.c.bf16 %v1580_v46, %v1578_v45 }
 0x14e   : > { %v608_v48 = vpop.f32.mrf.mxu0 }
 0x14f   : > { %v609_v52 = vadd.f32 %v608_v48, %v1525_v53  ;;  %v1135_v48 = vld [vmem:[%s1721_s3 + $0x20] sm:$0xff] }
 0x151   : > { %v618_v62 = vmul.f32 %v609_v52, %v609_v52 }
 0x156   : > { %v610_v49 = vpop.f32.mrf.mxu0 }
 0x157   : > { %v611_v51 = vadd.f32 %v610_v49, %v466_v60  ;;  %v1136_v49 = vld [vmem:[%s1721_s3 + $0x28] sm:$0xff] }
 0x159   : > { %v619_v56 = vmul.f32 %v611_v51, %v611_v51 }
 0x15b   : > { %v622_v1 = vadd.f32 %v619_v56, %v618_v62 }
 0x15e   : > { %v613_v50 = vpop.f32.mrf.mxu0 }
 0x15f   : > { %v614_v55 = vadd.f32 %v613_v50, %v1527_v54  ;;  %v1137_v50 = vld [vmem:[%s1721_s3 + $0x30] sm:$0xff] }
 0x161   : > { %v620_v63 = vmul.f32 %v614_v55, %v614_v55 }
 0x163   : > { %v623_v6 = vadd.f32 %v622_v1, %v620_v63 }
 0x166   : > { %v615_v0 = vpop.f32.mrf.mxu0 }
 0x167   : > { %v616_v2 = vadd.f32 %v615_v0, %v1536_v61 }
 0x169   : > { %v621_v7 = vmul.f32 %v616_v2, %v616_v2 }
 0x16b   : > { %v624_v8 = vadd.f32 %v623_v6, %v621_v7 }
 0x16d   : > { %v625_v9 = vrot.slane %v624_v8, 4 }
 0x16f   : > { %v626_v13 = vadd.f32 %v625_v9, %v624_v8 }
 0x171   : > { %v627_v14 = vrot.slane %v626_v13, 2 }
 0x173   : > { %v628_v15 = vadd.f32 %v627_v14, %v626_v13 }
 0x175   : > { %v629_v16 = vrot.slane %v628_v15, 1 }
 0x177   : > { %v630_v60 = vadd.f32 %v629_v16, %v628_v15 }
 0x179   : > { %v631_v17 = vmax.f32 %v630_v60, 2.5e-09 }
 0x17b   : > { %1208 = vrsqrt.f32 %v631_v17  ;;  %vm638_vm2 = vweird.f32 %v631_v17 }
 0x181   : > { %v1209_v53 = vpop.eup %1208 }
 0x182   : > { %v633_v54 = vmul.f32 %v1209_v53, %v631_v17  ;;  %vm639_vm1 = vweird.f32 %v1209_v53 }
 0x183   : > { %vm640_vm3 = vmor %vm638_vm2, %vm639_vm1 }
 0x184   : > { %v634_v18 = vmul.f32 %v1209_v53, %v633_v54 }
 0x186   : > { %v635_v22 = vmul.f32 0.5, %v634_v18 }
 0x188   : > { %v636_v23 = vsub.f32 1.5, %v635_v22 }
 0x18a   : > { %v637_v24 = vmul.f32 %v1209_v53, %v636_v23 }
 0x18c   : > { %v641_v61 = vsel %vm640_vm3, %v1209_v53, %v637_v24 }
 0x18d   : > { %v642_v25 = vmul.f32 2.4494898, %v641_v61 }
 0x18f   : > { %v645_v26 = vmul.f32 %v642_v25, %v614_v55  ;;  %v646_v30 = vmul.f32 %v642_v25, %v616_v2  ;;  %v643_v35 = vmul.f32 %v642_v25, %v609_v52  ;;  %v644_v36 = vmul.f32 %v642_v25, %v611_v51  ;;  %v1138_v51 = vld [vmem:[%s1721_s3 + $0x38] sm:$0xff] }
 0x190   : > { %v1611_v52 = vstv %s665_s9 }
 0x191   : > { %v664_v31 = vpack.c.bf16 %v646_v30, %v645_v26  ;;  %v663_v37 = vpack.c.bf16 %v644_v36, %v643_v35 }
 0x193   : > { %738 = vmatpush.bf16.msra.mxu1 %v664_v31 }
 0x197   : > { %739 = vmatpush.bf16.msra.mxu1 %v663_v37 }
 0x19a   : > { %1110 = vmatmul.msk.bf16.vlgmr.msra.gmra.mxu1 %vm707_vm4, %v1131_v41 }
 0x1aa   : > { %1111 = vmatmul.msk.bf16.gmra.mxu1 %vm707_vm4, %v1132_v42 }
 0x1ba   : > { %1112 = vmatmul.msk.bf16.gmra.mxu1 %vm707_vm4, %v1133_v43 }
 0x1ca   : > { %1113 = vmatmul.msk.bf16.gmra.mxu1 %vm707_vm4, %v1134_v44 }
 0x1da   : > { %1114 = vmatmul.msk.bf16.gmra.mxu1 %vm707_vm4, %v1135_v48 }
 0x1ea   : > { %1115 = vmatmul.msk.bf16.gmra.mxu1 %vm707_vm4, %v1136_v49 }
 0x1fa   : > { %1116 = vmatmul.msk.bf16.gmra.mxu1 %vm707_vm4, %v1137_v50 }
 0x20a   : > { %1117 = vmatmul.msk.bf16.gmra.mxu1 %vm707_vm4, %v1138_v51 }
 0x217   : > { %v741_v55 = vpop.f32.mrf.mxu1 }
 0x218   : > { %v742_v56 = vadd.f32 %v741_v55, %v1611_v52 }
 0x21a   : > { %v781_v62 = vmul.f32 1.442695, %v742_v56 }
 0x21c   : > { %1210 = vpow2.f32 %v781_v62 }
 0x21f   : > { %v743_v63 = vpop.f32.mrf.mxu1 }
 0x220   : > { %v744_v0 = vadd.f32 %v743_v63, %v1611_v52 }
 0x222   : > { %v783_v1 = vmul.f32 1.442695, %v744_v0  ;;  %v1211_v6 = vpop.eup %1210 }
 0x223   : > { %v813_v9 = vadd.f32 8.838835e-06, %v1211_v6 }
 0x224   : > { %1212 = vpow2.f32 %v783_v1 }
 0x227   : > { %v746_v2 = vpop.f32.mrf.mxu1 }
 0x228   : > { %v747_v8 = vadd.f32 %v746_v2, %v1611_v52 }
 0x22a   : > { %v1213_v7 = vpop.eup %1212  ;;  %v785_v15 = vmul.f32 1.442695, %v747_v8 }
 0x22b   : > { %v814_v13 = vadd.f32 8.838835e-06, %v1213_v7 }
 0x22c   : > { %1214 = vpow2.f32 %v785_v15 }
 0x22d   : > { %v1616_v14 = vpack.c.bf16 %v814_v13, %v813_v9 }
 0x22f   : > { %v748_v16 = vpop.f32.mrf.mxu1 }
 0x230   : > { %v749_v60 = vadd.f32 %v748_v16, %v1611_v52 }
 0x232   : > { %v787_v17 = vmul.f32 1.442695, %v749_v60  ;;  %v1215_v54 = vpop.eup %1214 }
 0x233   : > { %v815_v23 = vadd.f32 8.838835e-06, %v1215_v54 }
 0x234   : > { %1216 = vpow2.f32 %v787_v17 }
 0x237   : > { %v751_v53 = vpop.f32.mrf.mxu1 }
 0x238   : > { %v752_v22 = vadd.f32 %v751_v53, %v1611_v52 }
 0x23a   : > { %v1217_v18 = vpop.eup %1216  ;;  %v789_v25 = vmul.f32 1.442695, %v752_v22 }
 0x23b   : > { %v816_v24 = vadd.f32 8.838835e-06, %v1217_v18 }
 0x23c   : > { %1218 = vpow2.f32 %v789_v25 }
 0x23d   : > { %v1620_v61 = vpack.c.bf16 %v816_v24, %v815_v23 }
 0x23f   : > { %v753_v26 = vpop.f32.mrf.mxu1 }
 0x240   : > { %v754_v30 = vadd.f32 %v753_v26, %v1611_v52 }
 0x242   : > { %v791_v31 = vmul.f32 1.442695, %v754_v30  ;;  %v1219_v36 = vpop.eup %1218 }
 0x243   : > { %v817_v42 = vadd.f32 8.838835e-06, %v1219_v36 }
 0x244   : > { %1220 = vpow2.f32 %v791_v31 }
 0x247   : > { %v756_v35 = vpop.f32.mrf.mxu1 }
 0x248   : > { %v757_v41 = vadd.f32 %v756_v35, %v1611_v52 }
 0x24a   : > { %v1221_v37 = vpop.eup %1220  ;;  %v793_v48 = vmul.f32 1.442695, %v757_v41 }
 0x24b   : > { %v818_v43 = vadd.f32 8.838835e-06, %v1221_v37 }
 0x24c   : > { %1222 = vpow2.f32 %v793_v48 }
 0x24d   : > { %v1624_v44 = vpack.c.bf16 %v818_v43, %v817_v42 }
 0x24f   : > { %v758_v49 = vpop.f32.mrf.mxu1 }
 0x250   : > { %v759_v50 = vadd.f32 %v758_v49, %v1611_v52 }
 0x252   : > { %v795_v51 = vmul.f32 1.442695, %v759_v50  ;;  %v1223_v56 = vpop.eup %1222 }
 0x253   : > { %v819_v0 = vadd.f32 8.838835e-06, %v1223_v56 }
 0x254   : > { %1224 = vpow2.f32 %v795_v51 }
 0x257   : > { %v761_v55 = vpop.f32.mrf.mxu1 }
 0x258   : > { %v762_v63 = vadd.f32 %v761_v55, %v1611_v52 }
 0x25a   : > { %v1225_v62 = vpop.eup %1224  ;;  %v797_v6 = vmul.f32 1.442695, %v762_v63 }
 0x25b   : > { %v820_v1 = vadd.f32 8.838835e-06, %v1225_v62 }
 0x25c   : > { %1226 = vpow2.f32 %v797_v6 }
 0x25d   : > { %v856_v2 = vpack.c.bf16 %v820_v1, %v819_v0 }
 0x25f   : > { %v763_v7 = vpop.f32.mrf.mxu1 }
 0x260   : > { %v764_v8 = vadd.f32 %v763_v7, %v1611_v52 }
 0x262   : > { %v799_v9 = vmul.f32 1.442695, %v764_v8  ;;  %v1227_v15 = vpop.eup %1226 }
 0x263   : > { %v821_v60 = vadd.f32 8.838835e-06, %v1227_v15 }
 0x264   : > { %1228 = vpow2.f32 %v799_v9 }
 0x267   : > { %v766_v13 = vpop.f32.mrf.mxu1 }
 0x268   : > { %v767_v49 = vadd.f32 %v766_v13, %v1611_v52 }
 0x26a   : > { %v1229_v16 = vpop.eup %1228  ;;  %v801_v63 = vmul.f32 1.442695, %v767_v49 }
 0x26b   : > { %v822_v17 = vadd.f32 8.838835e-06, %v1229_v16 }
 0x26d   : > { %v857_v53 = vpack.c.bf16 %v822_v17, %v821_v60  ;;  %v834_v17 = vld [vmem:[%s1401_s30 + $0x28] sm:$0xff] }
 0x26f   : > { %v768_v54 = vpop.f32.mrf.mxu1 }
 0x270   : > { %v769_v43 = vadd.f32 %v768_v54, %v1611_v52 }
 0x272   : > { %v803_v55 = vmul.f32 1.442695, %v769_v43 }
 0x277   : > { %v771_v18 = vpop.f32.mrf.mxu1 }
 0x278   : > { %v772_v35 = vadd.f32 %v771_v18, %v1611_v52 }
 0x27a   : > { %v805_v41 = vmul.f32 1.442695, %v772_v35 }
 0x27f   : > { %v773_v22 = vpop.f32.mrf.mxu1 }
 0x280   : > { %v774_v30 = vadd.f32 %v773_v22, %v1611_v52 }
 0x282   : > { %v807_v37 = vmul.f32 1.442695, %v774_v30  ;;  %v836_v30 = vld [vmem:[%s1401_s30 + $0x38] sm:$0xff] }
 0x287   : > { %v776_v23 = vpop.f32.mrf.mxu1 }
 0x288   : > { %v777_v24 = vadd.f32 %v776_v23, %v1611_v52 }
 0x28a   : > { %v809_v25 = vmul.f32 1.442695, %v777_v24  ;;  %v835_v24 = vld [vmem:[%s1401_s30 + $0x30] sm:$0xff] }
 0x28c   : > { %1230 = vpow2.f32 %v809_v25 }
 0x28f   : > { %v778_v26 = vpop.f32.mrf.mxu1 }
 0x290   : > { %v779_v31 = vadd.f32 %v778_v26, %v1611_v52 }
 0x292   : > { %v811_v36 = vmul.f32 1.442695, %v779_v31  ;;  %v1231_v42 = vpop.eup %1230 }
 0x293   : > { %v827_v50 = vadd.f32 8.838835e-06, %v1231_v42  ;;  %v838_v42 = vld [vmem:[%s1401_s30 + $0x48] sm:$0xff] }
 0x294   : > { %1232 = vpow2.f32 %v811_v36  ;;  %v837_v36 = vld [vmem:[%s1401_s30 + $0x40] sm:$0xff] }
 0x295   : > { %1234 = vpow2.f32 %v807_v37 }
 0x296   : > { %1236 = vpow2.f32 %v805_v41 }
 0x297   : > { %1238 = vpow2.f32 %v803_v55 }
 0x298   : > { %1240 = vpow2.f32 %v801_v63 }
 0x29a   : > { %v1233_v48 = vpop.eup %1232 }
 0x29b   : > { %v828_v51 = vadd.f32 8.838835e-06, %v1233_v48  ;;  %v1235_v62 = vpop.eup %1234 }
 0x29c   : > { %v1237_v0 = vpop.eup %1236  ;;  %v826_v1 = vadd.f32 8.838835e-06, %v1235_v62 }
 0x29d   : > { %v860_v56 = vpack.c.bf16 %v828_v51, %v827_v50  ;;  %v825_v6 = vadd.f32 8.838835e-06, %v1237_v0  ;;  %v1239_v8 = vpop.eup %1238 }
 0x29e   : > { %v1241_v9 = vpop.eup %1240  ;;  %v824_v52 = vadd.f32 8.838835e-06, %v1239_v8 }
 0x29f   : > { %861 = vmatpush.bf16.xpose.msra.mxu2 %v860_v56  ;;  %1139 = vmatpush.bf16.xpose.msra.mxu3 %v860_v56  ;;  %v859_v7 = vpack.c.bf16 %v826_v1, %v825_v6  ;;  %v823_v13 = vadd.f32 8.838835e-06, %v1241_v9 }
 0x2a1   : > { %v858_v15 = vpack.c.bf16 %v824_v52, %v823_v13 }
 0x2a7   : > { %862 = vmatpush.bf16.xpose.msra.mxu2 %v859_v7  ;;  %1140 = vmatpush.bf16.xpose.msra.mxu3 %v859_v7 }
 0x2af   : > { %863 = vmatpush.bf16.xpose.msra.mxu2 %v858_v15  ;;  %1141 = vmatpush.bf16.xpose.msra.mxu3 %v858_v15 }
 0x2b7   : > { %864 = vmatpush.bf16.xpose.msra.mxu2 %v857_v53  ;;  %1142 = vmatpush.bf16.xpose.msra.mxu3 %v857_v53  ;;  %v844_v53 = vld [vmem:[%s1401_s30 + $0x78] sm:$0xff] }
 0x2bf   : > { %865 = vmatpush.bf16.xpose.msra.mxu2 %v856_v2  ;;  %1143 = vmatpush.bf16.xpose.msra.mxu3 %v856_v2 }
 0x2c7   : > { %866 = vmatpush.bf16.xpose.msra.mxu2 %v1624_v44  ;;  %1144 = vmatpush.bf16.xpose.msra.mxu3 %v1624_v44 }
 0x2cf   : > { %867 = vmatpush.bf16.xpose.msra.mxu2 %v1620_v61  ;;  %1145 = vmatpush.bf16.xpose.msra.mxu3 %v1620_v61  ;;  %v843_v61 = vld [vmem:[%s1401_s30 + $0x70] sm:$0xff] }
 0x2d7   : > { %868 = vmatpush.bf16.xpose.msra.mxu2 %v1616_v14  ;;  %1146 = vmatpush.bf16.xpose.msra.mxu3 %v1616_v14  ;;  %v833_v14 = vld [vmem:[%s1401_s30 + $0x20] sm:$0xff] }
 0x2de   : > { %869 = vmatmul.bf16.vlgmr.msra.gmra.mxu2 %v845_v59  ;;  %894 = vmatmul.bf16.vlgmr.msra.gmra.mxu3 %v850_v34 }
 0x2ee   : > { %874 = vmatmul.bf16.gmra.mxu2 %v846_v5  ;;  %899 = vmatmul.bf16.gmra.mxu3 %v851_v40 }
 0x2fe   : > { %879 = vmatmul.bf16.gmra.mxu2 %v847_v12  ;;  %904 = vmatmul.bf16.gmra.mxu3 %v852_v47 }
 0x30e   : > { %884 = vmatmul.bf16.gmra.mxu2 %v848_v21 }
 0x31e   : > { %889 = vmatmul.bf16.gmra.mxu2 %v849_v29 }
 0x361   : > { %v870_v59 = vpop.f32.mrf.mxu2  ;;  %v895_v3 = vpop.f32.mrf.mxu3 }
 0x362   : > { %v910_v4 = vadd.f32 %v870_v59, %v829_v57  ;;  %v920_v5 = vadd.f32 %v895_v3, %v839_v58 }
 0x364   : > { %926 = vst [vmem:[%s1401_s30] sm:$0xff] %v910_v4 }
 0x365   : > { %936 = vst [vmem:[%s1401_s30 + $0x50] sm:$0xff] %v920_v5 }
 0x369   : > { %v872_v12 = vpop.f32.mrf.mxu2  ;;  %v897_v19 = vpop.f32.mrf.mxu3 }
 0x36a   : > { %v911_v20 = vadd.f32 %v872_v12, %v830_v10  ;;  %v921_v21 = vadd.f32 %v897_v19, %v840_v11 }
 0x36c   : > { %927 = vst [vmem:[%s1401_s30 + $0x8] sm:$0xff] %v911_v20 }
 0x36d   : > { %937 = vst [vmem:[%s1401_s30 + $0x58] sm:$0xff] %v921_v21 }
 0x371   : > { %v875_v29 = vpop.f32.mrf.mxu2  ;;  %v900_v32 = vpop.f32.mrf.mxu3 }
 0x372   : > { %v912_v33 = vadd.f32 %v875_v29, %v831_v27  ;;  %v922_v34 = vadd.f32 %v900_v32, %v841_v28 }
 0x374   : > { %928 = vst [vmem:[%s1401_s30 + $0x10] sm:$0xff] %v912_v33 }
 0x375   : > { %938 = vst [vmem:[%s1401_s30 + $0x60] sm:$0xff] %v922_v34 }
 0x379   : > { %v877_v40 = vpop.f32.mrf.mxu2  ;;  %v902_v45 = vpop.f32.mrf.mxu3 }
 0x37a   : > { %v913_v46 = vadd.f32 %v877_v40, %v832_v38  ;;  %v923_v47 = vadd.f32 %v902_v45, %v842_v39 }
 0x37c   : > { %929 = vst [vmem:[%s1401_s30 + $0x18] sm:$0xff] %v913_v46 }
 0x37d   : > { %939 = vst [vmem:[%s1401_s30 + $0x68] sm:$0xff] %v923_v47 }
 0x381   : > { %v880_v44 = vpop.f32.mrf.mxu2  ;;  %v905_v2 = vpop.f32.mrf.mxu3 }
 0x382   : > { %v914_v16 = vadd.f32 %v880_v44, %v833_v14  ;;  %v924_v60 = vadd.f32 %v905_v2, %v843_v61 }
 0x384   : > { %930 = vst [vmem:[%s1401_s30 + $0x20] sm:$0xff] %v914_v16 }
 0x385   : > { %940 = vst [vmem:[%s1401_s30 + $0x70] sm:$0xff] %v924_v60 }
 0x389   : > { %v882_v54 = vpop.f32.mrf.mxu2  ;;  %v907_v18 = vpop.f32.mrf.mxu3 }
 0x38a   : > { %v915_v22 = vadd.f32 %v882_v54, %v834_v17  ;;  %v925_v23 = vadd.f32 %v907_v18, %v844_v53 }
 0x38c   : > { %931 = vst [vmem:[%s1401_s30 + $0x28] sm:$0xff] %v915_v22 }
 0x38d   : > { %941 = vst [vmem:[%s1401_s30 + $0x78] sm:$0xff] %v925_v23 }
 0x391   : > { %v885_v25 = vpop.f32.mrf.mxu2 }
 0x392   : > { %v916_v26 = vadd.f32 %v885_v25, %v835_v24 }
 0x394   : > { %932 = vst [vmem:[%s1401_s30 + $0x30] sm:$0xff] %v916_v26 }
 0x399   : > { %v887_v31 = vpop.f32.mrf.mxu2 }
 0x39a   : > { %v917_v35 = vadd.f32 %v887_v31, %v836_v30 }
 0x39c   : > { %933 = vst [vmem:[%s1401_s30 + $0x38] sm:$0xff] %v917_v35 }
 0x3a1   : > { %v890_v37 = vpop.f32.mrf.mxu2 }
 0x3a2   : > { %v918_v41 = vadd.f32 %v890_v37, %v837_v36 }
 0x3a4   : > { %934 = vst [vmem:[%s1401_s30 + $0x40] sm:$0xff] %v918_v41 }
 0x3a9   : > { %v892_v43 = vpop.f32.mrf.mxu2 }
 0x3aa   : > { %v919_v48 = vadd.f32 %v892_v43, %v838_v42 }
 0x3ac   : > { %935 = vst [vmem:[%s1401_s30 + $0x48] sm:$0xff] %v919_v48 }
 0x3ad PF: > { %s16_s26 = sadd.s32 1, %s1296_s26   ;;  %s1724_s20 = smov %s1276_s21 }
 0x3ae   : > { %p13_p12 = scmp.ge.s32.totalorder %s16_s26, 6   ;;  %s1725_s21 = smov %s1384_s7 }
 0x3af   : > { %s1726_s22 = smov %s1288_s24  ;;  %s1727_s23 = smov %s1292_s25 }
 0x3b0   : > { %s1728_s24 = smov %s1731_s4  ;;  %s1729_s25 = smov %s1735_s27 }
 0x3b1   :  { %15 = sbr.rel (!%p13_p12) target bundleno = 6 (0x6), region = 117 }

</bundles_post_ra>
